<compile_context>
chip_gen: v6e
topology: v6e:2x2x1
jax: 0.10.0
libtpu: 0.0.40
codegen_flags: <defaults>
</compile_context>

<pallas_src>
import functools

import jax
import jax.numpy as jnp
from jax.experimental import pallas as pl
from jax.experimental.pallas import tpu as pltpu


def _router_kernel(x_ref, w1_ref, b1_ref, w2_ref, b2_ref, w3_ref, b3_ref, o_ref):
    # Whole MLP hot path resident in VMEM: three MXU matmuls (bf16 in, f32 acc),
    # bias/ReLU in f32 on the VPU, bf16 casts between layers.
    x = x_ref[...].astype(jnp.bfloat16)                               # (block_b, D_in)
    h1 = jnp.dot(x, w1_ref[...], preferred_element_type=jnp.float32) + b1_ref[...]
    h1 = jnp.maximum(h1, 0.0).astype(jnp.bfloat16)                    # (block_b, 256)
    h2 = jnp.dot(h1, w2_ref[...], preferred_element_type=jnp.float32) + b2_ref[...]
    h2 = jnp.maximum(h2, 0.0).astype(jnp.bfloat16)                    # (block_b, 64)
    out = jnp.dot(h2, w3_ref[...], preferred_element_type=jnp.float32) + b3_ref[...]
    o_ref[...] = out.astype(o_ref.dtype)                              # (block_b, D_out)


def _round_up(x, m):
    return ((x + m - 1) // m) * m


def _auto_block_b(batch):
    """Largest overhead-amortizing batch tile that still leaves >= ~4 grid tiles
    (so v7x megacore can shard the 'parallel' axis across both TensorCores)."""
    if batch <= 8:
        return batch                      # tiny batch: single full-extent block
    bb = _round_up(-(-batch // 4), 8)     # ~batch/4, sublane-aligned
    return max(8, min(2048, bb))          # cap keeps VMEM well under v7x's 64 MiB


@functools.partial(jax.jit, static_argnames=("block_b",))
def router_forward(x, packed, block_b=None):
    """x: (B, input_dim) float32.  packed: pack_router_params() output — weights stored
    as (in, out) == PyTorch Linear.weight.T in bf16, biases (1, out) f32.
    Returns (B, output_dim) float32."""
    B, D_in = x.shape
    w1, b1 = packed["w1"], packed["b1"]   # (D_in, 256) bf16, (1, 256) f32
    w2, b2 = packed["w2"], packed["b2"]   # (256, 64)  bf16, (1, 64)  f32
    w3, b3 = packed["w3"], packed["b3"]   # (64, D_out) bf16, (1, D_out) f32
    H1, H2, D_out = w1.shape[1], w2.shape[1], w3.shape[1]

    if block_b is None:
        block_b = _auto_block_b(B)
    # Block second-minor dim must be a multiple of 8 or equal the full batch dim.
    block_b = B if block_b >= B else block_b

    grid = (pl.cdiv(B, block_b),)         # ragged last tile: OOB rows read garbage,
                                          # their outputs are discarded by Pallas.

    # Constant-index operands (weights / biases) only need a single VMEM buffer.
    def _const(a):
        return pl.BlockSpec(a.shape, lambda i: (0, 0), pipeline_mode=pl.Buffered(1))

    cost = pl.CostEstimate(
        flops=2 * B * (D_in * H1 + H1 * H2 + H2 * D_out),
        transcendentals=0,
        bytes_accessed=(B * D_in * 4                       # stream x once (f32)
                        + B * D_out * 4                    # unpadded f32 logits out
                        + (D_in * H1 + H1 * H2 + H2 * D_out) * 2   # bf16 weights
                        + (H1 + H2 + D_out) * 4),                  # f32 biases
    )

    out = pl.pallas_call(
        _router_kernel,
        out_shape=jax.ShapeDtypeStruct((B, D_out), jnp.float32),
        grid_spec=pltpu.PrefetchScalarGridSpec(
            num_scalar_prefetch=0,
            grid=grid,
            in_specs=[
                pl.BlockSpec((block_b, D_in), lambda i: (i, 0)),   # x tile (double-buffered)
                _const(w1), _const(b1),
                _const(w2), _const(b2),
                _const(w3), _const(b3),
            ],
            out_specs=pl.BlockSpec((block_b, D_out), lambda i: (i, 0)),
        ),
        compiler_params=pltpu.CompilerParams(
            dimension_semantics=("parallel",),
            # Above v5e's 16 MiB scoped default (unlocks big f32 x double-buffers),
            # comfortably under v7x's 64 MiB physical VMEM.
            vmem_limit_bytes=48 * 1024 * 1024,
        ),
        cost_estimate=cost,
    )(x, w1, b1, w2, b2, w3, b3)

    return out


def init_router_params(key, input_dim=1024, output_dim=3, dtype=jnp.float32):
    """Deterministic synthetic init (shapes match torch.nn.Linear layers)."""
    dims = [(input_dim, 256), (256, 64), (64, output_dim)]
    params = {}
    for idx, (fan_in, fan_out) in enumerate(dims, start=1):
        key, kw, kb = jax.random.split(key, 3)
        bound = 1.0 / jnp.sqrt(fan_in)
        # Stored as (in, out) == PyTorch weight.T
        params[f"w{idx}"] = jax.random.uniform(
            kw, (fan_in, fan_out), dtype, minval=-bound, maxval=bound)
        params[f"b{idx}"] = jax.random.uniform(
            kb, (1, fan_out), dtype, minval=-bound, maxval=bound)
    return params


def pack_router_params(params):
    """One-time packing: bf16 weights (MXU-native), f32 (1, out) biases.
    Hoisted out of the jitted forward so per-call HLO stays just the pallas_call."""
    packed = {}
    for idx in (1, 2, 3):
        packed[f"w{idx}"] = params[f"w{idx}"].astype(jnp.bfloat16)
        packed[f"b{idx}"] = params[f"b{idx}"].astype(jnp.float32).reshape(1, -1)
    return packed


def _reference_forward(x, p):
    # Same numerics as the kernel: bf16 matmul inputs, f32 accumulation / bias / ReLU.
    c = lambda a: a.astype(jnp.bfloat16)
    h1 = jnp.maximum(
        jnp.dot(c(x), c(p["w1"]), preferred_element_type=jnp.float32) + p["b1"], 0.0)
    h2 = jnp.maximum(
        jnp.dot(c(h1), c(p["w2"]), preferred_element_type=jnp.float32) + p["b2"], 0.0)
    return jnp.dot(c(h2), c(p["w3"]), preferred_element_type=jnp.float32) + p["b3"]


if __name__ == "__main__":
    key = jax.random.PRNGKey(0)
    kx, kp = jax.random.split(key)

    B, INPUT_DIM, OUTPUT_DIM = 300, 1024, 3   # B not a multiple of the tile on purpose
    x = jax.random.normal(kx, (B, INPUT_DIM), jnp.float32)
    params = init_router_params(kp, input_dim=INPUT_DIM, output_dim=OUTPUT_DIM)
    packed = pack_router_params(params)

    out = router_forward(x, packed)           # auto block_b -> 80, grid of 4 ragged tiles
    out = jax.block_until_ready(out)

    ref = _reference_forward(x, params)
    assert out.shape == (B, OUTPUT_DIM), out.shape
    assert jnp.allclose(out, ref, atol=2e-3, rtol=2e-3), "mismatch vs JAX reference"

    print("KERNEL_OK")
</pallas_src>

<mosaic_0001>
module attributes {stable_mosaic.version = 11 : i64} {
  func.func @_router_kernel(%arg0: i32, %arg1: memref<80x1024xf32, #tpu.memory_space<vmem>>, %arg2: memref<1024x256xbf16, #tpu.memory_space<vmem>>, %arg3: memref<1x256xf32, #tpu.memory_space<vmem>>, %arg4: memref<256x64xbf16, #tpu.memory_space<vmem>>, %arg5: memref<1x64xf32, #tpu.memory_space<vmem>>, %arg6: memref<64x3xbf16, #tpu.memory_space<vmem>>, %arg7: memref<1x3xf32, #tpu.memory_space<vmem>>, %arg8: memref<80x3xf32, #tpu.memory_space<vmem>>) attributes {dimension_semantics = [#tpu.dimension_semantics<parallel>], iteration_bounds = array<i64: 4>, scalar_prefetch = 0 : i64, scratch_operands = 0 : i64, tpu.core_type = #tpu.core_type<tc>, window_params = [{transform_indices = @transform_0, window_bounds = array<i64: 80, 1024>}, {pipeline_mode = #tpu.pipeline_mode<synchronous>, transform_indices = @transform_1, window_bounds = array<i64: 1024, 256>}, {pipeline_mode = #tpu.pipeline_mode<synchronous>, transform_indices = @transform_2, window_bounds = array<i64: 1, 256>}, {pipeline_mode = #tpu.pipeline_mode<synchronous>, transform_indices = @transform_3, window_bounds = array<i64: 256, 64>}, {pipeline_mode = #tpu.pipeline_mode<synchronous>, transform_indices = @transform_4, window_bounds = array<i64: 1, 64>}, {pipeline_mode = #tpu.pipeline_mode<synchronous>, transform_indices = @transform_5, window_bounds = array<i64: 64, 3>}, {pipeline_mode = #tpu.pipeline_mode<synchronous>, transform_indices = @transform_6, window_bounds = array<i64: 1, 3>}, {transform_indices = @transform_7, window_bounds = array<i64: 80, 3>}]} {
    %c0 = arith.constant 0 : index
    %c0_0 = arith.constant 0 : index
    %0 = vector.load %arg1[%c0, %c0_0] : memref<80x1024xf32, #tpu.memory_space<vmem>>, vector<80x1024xf32>
    %1 = arith.truncf %0 : vector<80x1024xf32> to vector<80x1024xbf16>
    %c0_1 = arith.constant 0 : index
    %c0_2 = arith.constant 0 : index
    %2 = vector.load %arg2[%c0_1, %c0_2] : memref<1024x256xbf16, #tpu.memory_space<vmem>>, vector<1024x256xbf16>
    %cst = arith.constant dense<0.000000e+00> : vector<80x256xf32>
    %3 = tpu.matmul %1, %2, %cst {dimension_numbers = #tpu.dot_dimension_numbers<[1], [0], [0], [1], [0, 0, 1, 1], [], []>} : vector<80x1024xbf16>, vector<1024x256xbf16>, vector<80x256xf32> -> vector<80x256xf32>
    %c0_3 = arith.constant 0 : index
    %c0_4 = arith.constant 0 : index
    %4 = vector.load %arg3[%c0_3, %c0_4] : memref<1x256xf32, #tpu.memory_space<vmem>>, vector<1x256xf32>
    %5 = vector.broadcast %4 : vector<1x256xf32> to vector<80x256xf32>
    %6 = arith.addf %3, %5 : vector<80x256xf32>
    %cst_5 = arith.constant 0.000000e+00 : f32
    %7 = vector.broadcast %cst_5 : f32 to vector<80x256xf32>
    %8 = arith.maximumf %6, %7 : vector<80x256xf32>
    %9 = arith.truncf %8 : vector<80x256xf32> to vector<80x256xbf16>
    %c0_6 = arith.constant 0 : index
    %c0_7 = arith.constant 0 : index
    %10 = vector.load %arg4[%c0_6, %c0_7] : memref<256x64xbf16, #tpu.memory_space<vmem>>, vector<256x64xbf16>
    %cst_8 = arith.constant dense<0.000000e+00> : vector<80x64xf32>
    %11 = tpu.matmul %9, %10, %cst_8 {dimension_numbers = #tpu.dot_dimension_numbers<[1], [0], [0], [1], [0, 0, 1, 1], [], []>} : vector<80x256xbf16>, vector<256x64xbf16>, vector<80x64xf32> -> vector<80x64xf32>
    %c0_9 = arith.constant 0 : index
    %c0_10 = arith.constant 0 : index
    %12 = vector.load %arg5[%c0_9, %c0_10] : memref<1x64xf32, #tpu.memory_space<vmem>>, vector<1x64xf32>
    %13 = vector.broadcast %12 : vector<1x64xf32> to vector<80x64xf32>
    %14 = arith.addf %11, %13 : vector<80x64xf32>
    %cst_11 = arith.constant 0.000000e+00 : f32
    %15 = vector.broadcast %cst_11 : f32 to vector<80x64xf32>
    %16 = arith.maximumf %14, %15 : vector<80x64xf32>
    %17 = arith.truncf %16 : vector<80x64xf32> to vector<80x64xbf16>
    %c0_12 = arith.constant 0 : index
    %c0_13 = arith.constant 0 : index
    %18 = vector.load %arg6[%c0_12, %c0_13] : memref<64x3xbf16, #tpu.memory_space<vmem>>, vector<64x3xbf16>
    %cst_14 = arith.constant dense<0.000000e+00> : vector<80x3xf32>
    %19 = tpu.matmul %17, %18, %cst_14 {dimension_numbers = #tpu.dot_dimension_numbers<[1], [0], [0], [1], [0, 0, 1, 1], [], []>} : vector<80x64xbf16>, vector<64x3xbf16>, vector<80x3xf32> -> vector<80x3xf32>
    %c0_15 = arith.constant 0 : index
    %c0_16 = arith.constant 0 : index
    %20 = vector.load %arg7[%c0_15, %c0_16] : memref<1x3xf32, #tpu.memory_space<vmem>>, vector<1x3xf32>
    %21 = vector.broadcast %20 : vector<1x3xf32> to vector<80x3xf32>
    %22 = arith.addf %19, %21 : vector<80x3xf32>
    %c0_17 = arith.constant 0 : index
    %c0_18 = arith.constant 0 : index
    %23 = vector.load %arg8[%c0_17, %c0_18] : memref<80x3xf32, #tpu.memory_space<vmem>>, vector<80x3xf32>
    tpu.vector_store %arg8[%c0_17, %c0_18], %22 {strides = array<i32>} : memref<80x3xf32, #tpu.memory_space<vmem>>, vector<80x3xf32>,
    return
  }
  func.func @transform_0(%arg0: i32) -> (i32, i32) {
    %c0_i32 = arith.constant 0 : i32
    %c0_i32_0 = arith.constant 0 : i32
    return %arg0, %c0_i32 : i32, i32
  }
  func.func @transform_1(%arg0: i32) -> (i32, i32) {
    %c0_i32 = arith.constant 0 : i32
    %c0_i32_0 = arith.constant 0 : i32
    %c0_i32_1 = arith.constant 0 : i32
    return %c0_i32, %c0_i32_0 : i32, i32
  }
  func.func @transform_2(%arg0: i32) -> (i32, i32) {
    %c0_i32 = arith.constant 0 : i32
    %c0_i32_0 = arith.constant 0 : i32
    %c0_i32_1 = arith.constant 0 : i32
    return %c0_i32, %c0_i32_0 : i32, i32
  }
  func.func @transform_3(%arg0: i32) -> (i32, i32) {
    %c0_i32 = arith.constant 0 : i32
    %c0_i32_0 = arith.constant 0 : i32
    %c0_i32_1 = arith.constant 0 : i32
    return %c0_i32, %c0_i32_0 : i32, i32
  }
  func.func @transform_4(%arg0: i32) -> (i32, i32) {
    %c0_i32 = arith.constant 0 : i32
    %c0_i32_0 = arith.constant 0 : i32
    %c0_i32_1 = arith.constant 0 : i32
    return %c0_i32, %c0_i32_0 : i32, i32
  }
  func.func @transform_5(%arg0: i32) -> (i32, i32) {
    %c0_i32 = arith.constant 0 : i32
    %c0_i32_0 = arith.constant 0 : i32
    %c0_i32_1 = arith.constant 0 : i32
    return %c0_i32, %c0_i32_0 : i32, i32
  }
  func.func @transform_6(%arg0: i32) -> (i32, i32) {
    %c0_i32 = arith.constant 0 : i32
    %c0_i32_0 = arith.constant 0 : i32
    %c0_i32_1 = arith.constant 0 : i32
    return %c0_i32, %c0_i32_0 : i32, i32
  }
  func.func @transform_7(%arg0: i32) -> (i32, i32) {
    %c0_i32 = arith.constant 0 : i32
    %c0_i32_0 = arith.constant 0 : i32
    return %arg0, %c0_i32 : i32, i32
  }
}

</mosaic_0001>

<bundles_post_ra>
// kernel: router_forward.1
= control target key start
LH: loop header
LB: loop body
LE: loop exit
PB: predicated region body
PF: predicated region fallthrough
CT: control target
= control target key end

     0   :  { %12 = vsyncpa [#allocation3], 0  ;;  %s3734_s0 = inlined_call_operand.hbm [shape: f32[300,1024], index: 0, kind: input, shape index: {}]   ;;  %s3735_s1 = inlined_call_operand.hbm [shape: bf16[1024,256], index: 1, kind: input, shape index: {}]   ;;  %s3736_s2 = inlined_call_operand.hbm [shape: f32[1,256], index: 2, kind: input, shape index: {}]   ;;  %s3737_s3 = inlined_call_operand.vmem [shape: bf16[256,64], index: 3, kind: input, shape index: {}]   ;;  %s3738_s4 = inlined_call_operand.hbm [shape: f32[1,64], index: 4, kind: input, shape index: {}]   ;;  %s3739_s5 = inlined_call_operand.vmem [shape: bf16[64,3], index: 5, kind: input, shape index: {}]   ;;  %s3740_s6 = inlined_call_operand.hbm [shape: f32[1,3], index: 6, kind: input, shape index: {}]   ;;  %s3741_s7 = inlined_call_operand.vmem [shape: f32[300,3], index: 7, kind: output, shape index: {}]  }
   0x1   :  { %14 = vsyncpa [#allocation3 + $0x1], 0 }
   0x2   :  { %15 = vsyncpa [#allocation5], 0 }
   0x3   :  { %16 = vsyncpa [#allocation8], 0  ;;  %s3219_s24 = smov 0   ;;  %s3221_s25 = smov 0  }
   0x4   :  { %s3223_s26 = smov 0   ;;  %s3225_s27 = smov 0  }
   0x5 LB: > { %s3238_s28 = sadd.s32 4294967295, %s3134_s27   ;;  %s3241_s29 = sadd.s32 1, %s3134_s27   ;;  %s3134_s27 = sphi %s3225_s27, %s3763_s27   ;;  %s3130_s26 = sphi %s3223_s26, %s3762_s26   ;;  %s3126_s25 = sphi %s3221_s25, %s3761_s25   ;;  %s3122_s24 = sphi %s3219_s24, %s3760_s24  }
   0x6   : > { %s26_s30 = ssub.s32 %s3134_s27, %s3241_s29  ;;  %s29_s8 = sadd.s32 1, %s3130_s26 }
   0x7   : > { %p27_p0 = scmp.eq.s32.totalorder %s26_s30, 0  ;;  %p36_p1 = scmp.ne.s32.totalorder %s3130_s26, %s3126_s25 }
   0x8   : > { %p37_p2 = scmp.eq.s32.totalorder %s3134_s27, 0  ;;  %p42_p3 = scmp.ne.s32.totalorder %s3126_s25, %s3122_s24 }
   0x9   : > { %s3251_s9 = scalar_select %p27_p0, %s3130_s26, %s29_s8  }
   0xa   : > { %p3253_p4 = por %p37_p2, %p36_p1  ;;  %p3742_p5 = scmp.eq.s32.totalorder %s3238_s28, 0 }
   0xb   : > { %p192_p6 = scmp.eq.s32.totalorder %s3238_s28, 3  ;;  %p2293_p7 = scmp.ge.s32.totalorder %s3134_s27, 1 }
   0xc   : > { %p3262_p8 = por %p3742_p5, %p42_p3  ;;  %p205_p9 = scmp.lt.s32.totalorder %s3134_s27, 5 }
   0xd   : > { %p3267_p10 = por %p192_p6, %p36_p1  ;;  %s3168_s14 = smov [#allocation4]  }
   0xe   : > { %s3746_s11 = scalar_select %p3262_p8, 1, 0 }
   0xf   : > { %s3747_s12 = scalar_select %p3267_p10, 1, 0 }
  0x10   : > { %p3271_p11 = pnand %p2293_p7, %p205_p9  ;;  %s217_s15 = sshll.u32 %s3168_s14, 4  ;;  %s218_s15 = int_to_ptr.vmem [resolvable:$true] %s217_s15 }
  0x11   : > { %s3169_s17 = smov [#allocation7]   ;;  %s3170_s19 = smov [#allocation6]  }
  0x12   : > { %s3748_s13 = scalar_select %p3271_p11, 1, 0 }
  0x13   : > { %p2586_p12 = pneg %p3271_p11  ;;  %s245_s18 = sshll.u32 %s3169_s17, 4  ;;  %s246_s18 = int_to_ptr.vmem [resolvable:$true] %s245_s18 }
  0x14   : > { %s231_s20 = sshll.u32 %s3170_s19, 4  ;;  %s2941_s21 = scalar_lea.vmem %s218_s15, 16384  ;;  %s232_s20 = int_to_ptr.vmem [resolvable:$true] %s231_s20 }
  0x15   : > { %p3279_p13 = pnand %p2586_p12, %p3742_p5  ;;  %p2942_p1 = scmp.ne.s32.totalorder %s218_s15, %s2941_s21 }
  0x16   : > { %p2949_p6 = scmp.lt.s32.totalorder %s218_s15, %s218_s15  ;;  %p2950_p7 = scmp.lt.s32.totalorder %s2941_s21, %s2941_s21 }
  0x17   : > { %p2932_p0 = pneg %p3279_p13 }
  0x18   : > { %p2951_p9 = por %p2950_p7, %p2949_p6 }
  0x19   : > { %p2944_p2 = pnand %p2942_p1, %p2932_p0 }
  0x1b   : > { %p2945_p3 = pneg %p2944_p2 }
  0x1d   : > { %p2952_p12 = pnand %p2951_p9, %p2945_p3 }
  0x1f   : > { %2955 = shalt.err (!%p2952_p12)
}
  0x20   : > { %s3171_s22 = smov 128   ;;  %s3172_s23 = smov 8  }
  0x21   : > { %2589 = dma.hbm_to_vmem [thread:$0]  (!%p3279_p13), %s3735_s1, 16384, %s218_s15, [#allocation5], %s3171_s22, %s3171_s22, %s3172_s23  }
  0x22   : > { %s2967_s8 = scalar_lea.vmem %s246_s18, 16  ;;  %s2974_s14 = scalar_lea.vmem %s246_s18, 32 }
  0x23   : > { %p2968_p5 = scmp.ne.s32.totalorder %s246_s18, %s2967_s8  ;;  %p2975_p10 = scmp.lt.s32.totalorder %s246_s18, %s246_s18 }
  0x24   : > { %p2976_p6 = scmp.lt.s32.totalorder %s2974_s14, %s2967_s8 }
  0x25   : > { %p2970_p1 = pnand %p2968_p5, %p2932_p0 }
  0x26   : > { %p2977_p3 = por %p2976_p6, %p2975_p10 }
  0x27   : > { %p2971_p2 = pneg %p2970_p1 }
  0x29   : > { %p2978_p7 = pnand %p2977_p3, %p2971_p2 }
  0x2b   : > { %2981 = shalt.err (!%p2978_p7)
}
  0x2c   : > { %2595 = dma.hbm_to_vmem [thread:$0]  (!%p3279_p13), %s3738_s4, 16, %s246_s18, [#allocation8]  }
  0x2d   : > { %s2993_s15 = scalar_lea.vmem %s232_s20, 32  ;;  %p3001_p1 = scmp.lt.s32.totalorder %s232_s20, %s232_s20 }
  0x2e   : > { %p2994_p9 = scmp.ne.s32.totalorder %s232_s20, %s2993_s15  ;;  %p3002_p8 = scmp.lt.s32.totalorder %s2993_s15, %s2993_s15 }
  0x30   : > { %p2996_p5 = pnand %p2994_p9, %p2932_p0  ;;  %p3003_p11 = por %p3002_p8, %p3001_p1 }
  0x32   : > { %p2997_p12 = pneg %p2996_p5 }
  0x34   : > { %p3004_p10 = pnand %p3003_p11, %p2997_p12 }
  0x36   : > { %3007 = shalt.err (!%p3004_p10)
}
  0x37   : > { %2592 = dma.hbm_to_vmem [thread:$0]  (!%p3279_p13), %s3736_s2, 32, %s232_s20, [#allocation5]  }
  0x38   : > { %s3173_s18 = smov [#allocation9]  }
  0x39   : > { %s259_s23 = sshll.u32 %s3173_s18, 4  ;;  %s260_s23 = int_to_ptr.vmem [resolvable:$true] %s259_s23 }
  0x3a   : > { %s3019_s24 = scalar_lea.vmem %s260_s23, 16  ;;  %s3026_s30 = scalar_lea.vmem %s260_s23, 32 }
  0x3b   : > { %p3020_p2 = scmp.ne.s32.totalorder %s260_s23, %s3019_s24  ;;  %p3027_p8 = scmp.lt.s32.totalorder %s260_s23, %s260_s23 }
  0x3c   : > { %p3028_p11 = scmp.lt.s32.totalorder %s3026_s30, %s3019_s24 }
  0x3d   : > { %p3022_p6 = pnand %p3020_p2, %p2932_p0 }
  0x3e   : > { %p3029_p7 = por %p3028_p11, %p3027_p8 }
  0x3f   : > { %p3023_p3 = pneg %p3022_p6 }
  0x41   : > { %p3030_p9 = pnand %p3029_p7, %p3023_p3 }
  0x43   : > { %3033 = shalt.err (!%p3030_p9)
}
  0x44   : > { %2598 = dma.hbm_to_vmem [thread:$0]  (!%p3279_p13), %s3740_s6, 16, %s260_s23, [#allocation8]  }
  0x45   : > { %p2298_p5 = scmp.ge.s32.totalorder %s3134_s27, 4 }
  0x47   : > { %266 = sbr.rel (%p2298_p5) target bundleno = 110 (0x6e), region = 40 }
  0x4c   : > { %269 = sbr.rel (!%p3253_p4) target bundleno = 110 (0x6e), region = 44  ;;  %s270_s20 = sand.u32 (%p3253_p4), 1, %s3130_s26  }
  0x4d   : > { %s275_s17 = smul.u32 (%p3253_p4), 10, %s3134_s27  ;;  %s3325_s22 = scalar_lea.sflag (%p3253_p4), [#allocation3], %s270_s20 }
  0x4e   : > { %s2566_s19 = smul.u32 (%p3253_p4), 640, %s270_s20 }
  0x4f   : > { %s276_s15 = ssub.s32 (%p3253_p4), 38, %s275_s17 }
  0x50   : > { %p277_p0 = scmp.lt.s32.totalorder (%p3253_p4), %s276_s15, 10  ;;  %s274_s18 = scalar_lea.vmem (%p3253_p4), [#allocation2], %s2566_s19 }
  0x52   : > { %s3765_s15 = smov (!%p277_p0, %s276_s15), 10 }
  0x53   : > { %s3322_s21 = sshll.u32 %s3765_s15, 10 }
  0x54   : > { %s282_s16 = ssub.s32 10240, %s3322_s21 }
  0x55   : > { %283 = vsyncadd %s3325_s22, %s282_s16  ;;  %p2301_p4 = scmp.ne.s32.totalorder %s3322_s21, 0  ;;  %s2482_s10 = smul.u32 10240, %s3134_s27 }
  0x56   : > { %s289_s23 = sshll.u32 %s274_s18, 4  ;;  %s3038_s27 = scalar_lea.hbm %s3734_s0, 38912  ;;  %s3335_s23 = int_to_ptr.vmem [resolvable:$true] %s289_s23 }
  0x57   : > { %s3333_s8 = scalar_lea.hbm %s3734_s0, %s2482_s10 }
  0x58   : > { %s3034_s14 = scalar_lea.hbm %s3333_s8, %s3322_s21  ;;  %p3039_p10 = scmp.lt.s32.totalorder %s3333_s8, %s3734_s0 }
  0x59   : > { %p3035_p13 = scmp.ne.s32.totalorder %s3333_s8, %s3034_s14  ;;  %p3040_p2 = scmp.lt.s32.totalorder %s3038_s27, %s3034_s14 }
  0x5b   : > { %p3036_p12 = pnand %p3035_p13, %p2301_p4  ;;  %p3041_p6 = por %p3040_p2, %p3039_p10 }
  0x5d   : > { %p3037_p1 = pneg %p3036_p12 }
  0x5f   : > { %p3042_p3 = pnand %p3041_p6, %p3037_p1 }
  0x61   : > { %3045 = shalt.err (!%p3042_p3)
}
  0x62   : > { %s3046_s16 = scalar_lea.vmem %s3335_s23, %s3322_s21  ;;  %s3174_s18 = smov [#allocation2]  }
  0x63   : > { %p3047_p8 = scmp.ne.s32.totalorder %s3335_s23, %s3046_s16  ;;  %s3050_s10 = sshll.u32 %s3174_s18, 4  ;;  %s3051_s10 = int_to_ptr.vmem [resolvable:$false] %s3050_s10 }
  0x64   : > { %s3052_s24 = scalar_lea.vmem %s3051_s10, 20480  ;;  %p3053_p9 = scmp.lt.s32.totalorder %s3335_s23, %s3051_s10 }
  0x65   : > { %p3048_p11 = pnand %p3047_p8, %p2301_p4  ;;  %p3054_p5 = scmp.lt.s32.totalorder %s3052_s24, %s3046_s16 }
  0x67   : > { %p3049_p7 = pneg %p3048_p11  ;;  %p3055_p0 = por %p3054_p5, %p3053_p9 }
  0x69   : > { %p3056_p13 = pnand %p3055_p0, %p3049_p7 }
  0x6b   : > { %3059 = shalt.err (!%p3056_p13)
}
  0x6c   : > { %s3175_s30 = smov 1024   ;;  %s3176_s14 = smov 64  }
  0x6d   : > { %295 = dma.hbm_to_vmem [thread:$0]  (%p2301_p4), %s3333_s8, %s3322_s21, %s3335_s23, %s3325_s22, %s3175_s30, %s3175_s30, %s3176_s14  }
  0x6e PF: > { %p3750_p12 = scmp.ne.s32.totalorder %s3748_s13, 0 }
  0x6f   : > { %s3364_s20 = sand.u32 (!%p3750_p12), 1, %s3126_s25   ;;  %p3751_p1 = scmp.ne.s32.totalorder (!%p3750_p12), %s3746_s11, 0 }
  0x70   : > { %301 = sbr.rel (%p3750_p12) target bundleno = 953 (0x3b9), region = 48  ;;  %s304_s27 = scalar_lea.sflag (!%p3750_p12), [#allocation3], %s3364_s20 }
  0x71   : > { %s2567_s17 = smul.u32 (!%p3750_p12), 640, %s3364_s20 }
  0x73   : > { %s3368_s19 = scalar_lea.vmem (!%p3750_p12), [#allocation2], %s2567_s17 }
  0x75   : > { %3109 = dma.done.wait (%p3751_p1), %s304_s27, 10240  }
  0x76   : > { %3111 = vsyncadd (%p3751_p1), %s304_s27, 4294957056  ;;  %p3752_p4 = scmp.eq.s32.totalorder %s3238_s28, 0 }
  0x78   : > { %3113 = dma.done.wait (%p3752_p4), [#allocation5], 16416   ;;  %p3753_p10 = pmov %p3752_p4 }
  0x79   : > { %p3754_p2 = pmov %p3752_p4 }
  0x7a   : > { %3115 = vsyncadd (%p3753_p10), [#allocation5], 4294950880 }
  0x7b   : > { %3117 = dma.done.wait (%p3754_p2), [#allocation8], 32   ;;  %p3755_p6 = pmov %p3754_p2 }
  0x7c   : > { %v2714_v0 = vld [vmem:[#allocation4 + $0x74] ss:$8 sps:$4 sm:$0xff]   ;;  %v2718_v2 = vld [vmem:[#allocation4 + $0x70] ss:$8 sps:$4 sm:$0xff]   ;;  %v2720_v4 = vld [vmem:[#allocation4 + $0x64] ss:$8 sps:$4 sm:$0xff]  }
  0x7d   : > { %3119 = vsyncadd (%p3755_p6), [#allocation8], 4294967264  ;;  %v2716_v1 = vld [vmem:[#allocation4 + $0x174] ss:$8 sps:$4 sm:$0xff]   ;;  %1265 = vmatprep.subr.bf16.mxu0 %v2714_v0  ;;  %v2719_v3 = vld [vmem:[#allocation4 + $0x170] ss:$8 sps:$4 sm:$0xff]  }
  0x7e   : > { %1348 = vmatprep.subr.bf16.mxu1 %v2716_v1  ;;  %1266 = vmatpush1.bf16.msra.mxu0 %v2718_v2  ;;  %v2722_v5 = vld [vmem:[#allocation4 + $0x164] ss:$8 sps:$4 sm:$0xff]   ;;  %v2724_v6 = vld [vmem:[#allocation4 + $0x60] ss:$8 sps:$4 sm:$0xff]   ;;  %v2726_v8 = vld [vmem:[#allocation4 + $0x54] ss:$8 sps:$4 sm:$0xff]  }
  0x7f   : > { %1349 = vmatpush1.bf16.msra.mxu1 %v2719_v3  ;;  %1267 = vmatprep.subr.bf16.mxu0 %v2720_v4  ;;  %v2725_v7 = vld [vmem:[#allocation4 + $0x160] ss:$8 sps:$4 sm:$0xff]   ;;  %v2728_v9 = vld [vmem:[#allocation4 + $0x154] ss:$8 sps:$4 sm:$0xff]   ;;  %v2730_v10 = vld [vmem:[#allocation4 + $0x50] ss:$8 sps:$4 sm:$0xff]  }
  0x80   : > { %1350 = vmatprep.subr.bf16.mxu1 %v2722_v5  ;;  %v2731_v11 = vld [vmem:[#allocation4 + $0x150] ss:$8 sps:$4 sm:$0xff]   ;;  %v2732_v12 = vld [vmem:[#allocation4 + $0x44] ss:$8 sps:$4 sm:$0xff]   ;;  %v2736_v14 = vld [vmem:[#allocation4 + $0x40] ss:$8 sps:$4 sm:$0xff]  }
  0x81   : > { %v2734_v13 = vld [vmem:[#allocation4 + $0x144] ss:$8 sps:$4 sm:$0xff]   ;;  %v2737_v15 = vld [vmem:[#allocation4 + $0x140] ss:$8 sps:$4 sm:$0xff]   ;;  %v2738_v16 = vld [vmem:[#allocation4 + $0x34] ss:$8 sps:$4 sm:$0xff]  }
  0x82   : > { %1268 = vmatpush1.bf16.msra.mxu0 %v2724_v6  ;;  %v2740_v17 = vld [vmem:[#allocation4 + $0x134] ss:$8 sps:$4 sm:$0xff]   ;;  %v2742_v18 = vld [vmem:[#allocation4 + $0x30] ss:$8 sps:$4 sm:$0xff]   ;;  %v2744_v20 = vld [vmem:[#allocation4 + $0x24] ss:$8 sps:$4 sm:$0xff]  }
  0x83   : > { %1351 = vmatpush1.bf16.msra.mxu1 %v2725_v7  ;;  %1269 = vmatprep.subr.bf16.mxu0 %v2726_v8  ;;  %v2743_v19 = vld [vmem:[#allocation4 + $0x130] ss:$8 sps:$4 sm:$0xff]   ;;  %v2746_v21 = vld [vmem:[#allocation4 + $0x124] ss:$8 sps:$4 sm:$0xff]   ;;  %v2748_v22 = vld [vmem:[#allocation4 + $0x20] ss:$8 sps:$4 sm:$0xff]  }
  0x84   : > { %1352 = vmatprep.subr.bf16.mxu1 %v2728_v9  ;;  %v2749_v23 = vld [vmem:[#allocation4 + $0x120] ss:$8 sps:$4 sm:$0xff]   ;;  %v2750_v24 = vld [vmem:[#allocation4 + $0x14] ss:$8 sps:$4 sm:$0xff]   ;;  %v2754_v26 = vld [vmem:[#allocation4 + $0x10] ss:$8 sps:$4 sm:$0xff]  }
  0x85   : > { %v2752_v25 = vld [vmem:[#allocation4 + $0x114] ss:$8 sps:$4 sm:$0xff]   ;;  %v2755_v27 = vld [vmem:[#allocation4 + $0x110] ss:$8 sps:$4 sm:$0xff]   ;;  %v2756_v28 = vld [vmem:[#allocation4 + $0x4] ss:$8 sps:$4 sm:$0xff]  }
  0x86   : > { %1270 = vmatpush1.bf16.msra.mxu0 %v2730_v10  ;;  %v2758_v29 = vld [vmem:[#allocation4 + $0x104] ss:$8 sps:$4 sm:$0xff]   ;;  %v2760_v30 = vld [vmem:[#allocation4] ss:$8 sps:$4 sm:$0xff]   ;;  %v2762_v32 = vld [vmem:[#allocation4 + $0xf4] ss:$8 sps:$4 sm:$0xff]  }
  0x87   : > { %1353 = vmatpush1.bf16.msra.mxu1 %v2731_v11  ;;  %1271 = vmatprep.subr.bf16.mxu0 %v2732_v12  ;;  %v2761_v31 = vld [vmem:[#allocation4 + $0x100] ss:$8 sps:$4 sm:$0xff]   ;;  %v2764_v33 = vld [vmem:[#allocation4 + $0x1f4] ss:$8 sps:$4 sm:$0xff]   ;;  %v2766_v34 = vld [vmem:[#allocation4 + $0xf0] ss:$8 sps:$4 sm:$0xff]  }
  0x88   : > { %1354 = vmatprep.subr.bf16.mxu1 %v2734_v13  ;;  %v2767_v35 = vld [vmem:[#allocation4 + $0x1f0] ss:$8 sps:$4 sm:$0xff]   ;;  %v2768_v36 = vld [vmem:[#allocation4 + $0xe4] ss:$8 sps:$4 sm:$0xff]   ;;  %v2772_v38 = vld [vmem:[#allocation4 + $0xe0] ss:$8 sps:$4 sm:$0xff]  }
  0x89   : > { %v2770_v37 = vld [vmem:[#allocation4 + $0x1e4] ss:$8 sps:$4 sm:$0xff]   ;;  %v2773_v39 = vld [vmem:[#allocation4 + $0x1e0] ss:$8 sps:$4 sm:$0xff]   ;;  %v2774_v40 = vld [vmem:[#allocation4 + $0xd4] ss:$8 sps:$4 sm:$0xff]  }
  0x8a   : > { %1272 = vmatpush1.bf16.msra.mxu0 %v2736_v14  ;;  %v2776_v41 = vld [vmem:[#allocation4 + $0x1d4] ss:$8 sps:$4 sm:$0xff]   ;;  %v2778_v42 = vld [vmem:[#allocation4 + $0xd0] ss:$8 sps:$4 sm:$0xff]   ;;  %v2780_v44 = vld [vmem:[#allocation4 + $0xc4] ss:$8 sps:$4 sm:$0xff]  }
  0x8b   : > { %1355 = vmatpush1.bf16.msra.mxu1 %v2737_v15  ;;  %1273 = vmatprep.subr.bf16.mxu0 %v2738_v16  ;;  %v2779_v43 = vld [vmem:[#allocation4 + $0x1d0] ss:$8 sps:$4 sm:$0xff]   ;;  %v2782_v45 = vld [vmem:[#allocation4 + $0x1c4] ss:$8 sps:$4 sm:$0xff]   ;;  %v2784_v50 = vld [vmem:[#allocation4 + $0xc0] ss:$8 sps:$4 sm:$0xff]  }
  0x8c   : > { %1356 = vmatprep.subr.bf16.mxu1 %v2740_v17  ;;  %v366_v46 = vld [vmem:[%s3368_s19 + $0x8] sm:$0xff]  ;;  %v368_v48 = vld [vmem:[%s3368_s19 + $0x18] sm:$0xff]  ;;  %v365_v6 = vld [vmem:[%s3368_s19] sm:$0xff]  ;;  %vm3178_vm0 = vmmov 0   ;;  %vm1889_vm1 = vcmask 523264   ;;  %s2568_s18 = smul.u32 80, %s3364_s20 }
  0x8d   : > { %v374_v47 = vld [vmem:[%s3368_s19 + $0x48] sm:$0xff]  ;;  %v376_v49 = vld [vmem:[%s3368_s19 + $0x58] sm:$0xff]  ;;  %v373_v7 = vld [vmem:[%s3368_s19 + $0x40] sm:$0xff]  ;;  %vm1978_vm2 = vcmask 23552   ;;  %p3756_p3 = scmp.ne.s32.totalorder %s3747_s12, 0 }
  0x8e   : > { %1274 = vmatpush1.bf16.msra.mxu0 %v2742_v18  ;;  %v2785_v51 = vld [vmem:[#allocation4 + $0x1c0] ss:$8 sps:$4 sm:$0xff]   ;;  %v2786_v52 = vld [vmem:[#allocation4 + $0xb4] ss:$8 sps:$4 sm:$0xff]   ;;  %v446_v53 = vpack.c.bf16 %v374_v47, %v366_v46  ;;  %v448_v54 = vpack.c.bf16 %v376_v49, %v368_v48  ;;  %v2790_v56 = vld [vmem:[#allocation4 + $0xb0] ss:$8 sps:$4 sm:$0xff]   ;;  %v445_v12 = vpack.c.bf16 %v373_v7, %v365_v6 }
  0x8f   : > { %1357 = vmatpush1.bf16.msra.mxu1 %v2743_v19  ;;  %1275 = vmatprep.subr.bf16.mxu0 %v2744_v20  ;;  %v2788_v55 = vld [vmem:[#allocation4 + $0x1b4] ss:$8 sps:$4 sm:$0xff]   ;;  %v2791_v57 = vld [vmem:[#allocation4 + $0x1b0] ss:$8 sps:$4 sm:$0xff]   ;;  %v2792_v58 = vld [vmem:[#allocation4 + $0xa4] ss:$8 sps:$4 sm:$0xff]  }
  0x90   : > { %1358 = vmatprep.subr.bf16.mxu1 %v2746_v21  ;;  %1297 = vmatprep.mubr.bf16.mxu0 %v446_v53  ;;  %v2794_v59 = vld [vmem:[#allocation4 + $0x1a4] ss:$8 sps:$4 sm:$0xff]   ;;  %v2796_v60 = vld [vmem:[#allocation4 + $0xa0] ss:$8 sps:$4 sm:$0xff]   ;;  %v2798_v62 = vld [vmem:[#allocation4 + $0x94] ss:$8 sps:$4 sm:$0xff]  }
  0x91   : > { %1380 = vmatprep.mubr.bf16.mxu1 %v448_v54  ;;  %v2797_v61 = vld [vmem:[#allocation4 + $0x1a0] ss:$8 sps:$4 sm:$0xff]   ;;  %v2800_v63 = vld [vmem:[#allocation4 + $0x194] ss:$8 sps:$4 sm:$0xff]   ;;  %v2802_v0 = vld [vmem:[#allocation4 + $0x90] ss:$8 sps:$4 sm:$0xff]  }
  0x92   : > { %1276 = vmatpush1.bf16.msra.mxu0 %v2748_v22  ;;  %v2803_v1 = vld [vmem:[#allocation4 + $0x190] ss:$8 sps:$4 sm:$0xff]   ;;  %v2804_v2 = vld [vmem:[#allocation4 + $0x84] ss:$8 sps:$4 sm:$0xff]   ;;  %v2808_v4 = vld [vmem:[#allocation4 + $0x80] ss:$8 sps:$4 sm:$0xff]  }
  0x93   : > { %1359 = vmatpush1.bf16.msra.mxu1 %v2749_v23  ;;  %1277 = vmatprep.subr.bf16.mxu0 %v2750_v24  ;;  %v2806_v3 = vld [vmem:[#allocation4 + $0x184] ss:$8 sps:$4 sm:$0xff]   ;;  %v2809_v5 = vld [vmem:[#allocation4 + $0x180] ss:$8 sps:$4 sm:$0xff]   ;;  %v367_v8 = vld [vmem:[%s3368_s19 + $0x10] sm:$0xff]  ;;  %s3650_s10 = scalar_lea.vmem [#allocation10], %s2568_s18  }
  0x94   : > { %1360 = vmatprep.subr.bf16.mxu1 %v2752_v25  ;;  %v375_v9 = vld [vmem:[%s3368_s19 + $0x50] sm:$0xff]  ;;  %v2818_v16 = vld [vmem:[#allocation4 + $0x264] ss:$8 sps:$4 sm:$0xff]   ;;  %v384_v20 = vld [vmem:[%s3368_s19 + $0x98] sm:$0xff]  ;;  %s1996_s20 = smul.u32 (%p3756_p3), 10, %s3238_s28 }
  0x95   : > { %v2812_v10 = vld [vmem:[#allocation4 + $0x274] ss:$8 sps:$4 sm:$0xff]   ;;  %v447_v13 = vpack.c.bf16 %v375_v9, %v367_v8  ;;  %v2810_v14 = vld [vmem:[#allocation4 + $0x270] ss:$8 sps:$4 sm:$0xff]   ;;  %v382_v17 = vld [vmem:[%s3368_s19 + $0x88] sm:$0xff]  ;;  %s2481_s24 = smul.u32 (%p3756_p3), 80, %s3238_s28 }
  0x96   : > { %1278 = vmatpush1.bf16.msra.mxu0 %v2754_v26  ;;  %v2815_v11 = vld [vmem:[#allocation4 + $0x374] ss:$8 sps:$4 sm:$0xff]   ;;  %v2813_v15 = vld [vmem:[#allocation4 + $0x370] ss:$8 sps:$4 sm:$0xff]   ;;  %v390_v18 = vld [vmem:[%s3368_s19 + $0xc8] sm:$0xff]  ;;  %s1997_s30 = ssub.s32 (%p3756_p3), 38, %s1996_s20 }
  0x97   : > { %1361 = vmatpush1.bf16.msra.mxu1 %v2755_v27  ;;  %1279 = vmatprep.subr.bf16.mxu0 %v2756_v28  ;;  %v2821_v19 = vld [vmem:[#allocation4 + $0x364] ss:$8 sps:$4 sm:$0xff]   ;;  %v392_v21 = vld [vmem:[%s3368_s19 + $0xd8] sm:$0xff]  ;;  %v2816_v22 = vld [vmem:[#allocation4 + $0x260] ss:$8 sps:$4 sm:$0xff]   ;;  %v454_v24 = vpack.c.bf16 %v390_v18, %v382_v17  ;;  %p1998_p8 = scmp.lt.s32.totalorder (%p3756_p3), %s1997_s30, 10  ;;  %s3679_s27 = scalar_lea.vmem (%p3756_p3), %s3741_s7, %s2481_s24  }
  0x98   : > { %1362 = vmatprep.subr.bf16.mxu1 %v2758_v29  ;;  %v2819_v23 = vld [vmem:[#allocation4 + $0x360] ss:$8 sps:$4 sm:$0xff]   ;;  %v456_v26 = vpack.c.bf16 %v392_v21, %v384_v20  ;;  %v2824_v27 = vld [vmem:[#allocation4 + $0x254] ss:$8 sps:$4 sm:$0xff]   ;;  %v2837_v53 = vld [vmem:[#allocation4 + $0x330] ss:$8 sps:$4 sm:$0xff]  }
  0x99   : > { %v381_v25 = vld [vmem:[%s3368_s19 + $0x80] sm:$0xff]  ;;  %v383_v29 = vld [vmem:[%s3368_s19 + $0x90] sm:$0xff]  ;;  %v440_v17 = vld [vmem:[%s3368_s19 + $0x258] sm:$0xff] }
  0x9a   : > { %1280 = vmatpush1.bf16.msra.mxu0 %v2760_v30  ;;  %v389_v28 = vld [vmem:[%s3368_s19 + $0xc0] sm:$0xff]  ;;  %v391_v30 = vld [vmem:[%s3368_s19 + $0xd0] sm:$0xff] }
  0x9b   : > { %1363 = vmatpush1.bf16.msra.mxu1 %v2761_v31  ;;  %1281 = vmatprep.subr.bf16.mxu0 %v2762_v32  ;;  %v2827_v31 = vld [vmem:[#allocation4 + $0x354] ss:$8 sps:$4 sm:$0xff]   ;;  %v2822_v32 = vld [vmem:[#allocation4 + $0x250] ss:$8 sps:$4 sm:$0xff]   ;;  %v405_v48 = vld [vmem:[%s3368_s19 + $0x140] sm:$0xff] }
  0x9c   : > { %1364 = vmatprep.subr.bf16.mxu1 %v2764_v33  ;;  %v2825_v33 = vld [vmem:[#allocation4 + $0x350] ss:$8 sps:$4 sm:$0xff]   ;;  %v2836_v47 = vld [vmem:[#allocation4 + $0x234] ss:$8 sps:$4 sm:$0xff]   ;;  %v2852_v18 = vld [vmem:[#allocation4 + $0x200] ss:$8 sps:$4 sm:$0xff]  }
  0x9d   : > { %v399_v49 = vld [vmem:[%s3368_s19 + $0x110] sm:$0xff]  ;;  %v429_v21 = vld [vmem:[%s3368_s19 + $0x200] sm:$0xff] }
  0x9e   : > { %1282 = vmatpush2.bf16.msra.mxu0 %v2766_v34  ;;  %v453_v34 = vpack.c.bf16 %v389_v28, %v381_v25  ;;  %v423_v6 = vld [vmem:[%s3368_s19 + $0x1d0] sm:$0xff] }
  0x9f   : > { %1365 = vmatpush2.bf16.msra.mxu1 %v2767_v35  ;;  %1283 = vmatprep.subr.bf16.mxu0 %v2768_v36  ;;  %v455_v35 = vpack.c.bf16 %v391_v30, %v383_v29  ;;  %v2830_v36 = vld [vmem:[#allocation4 + $0x244] ss:$8 sps:$4 sm:$0xff]   ;;  %v2851_v7 = vld [vmem:[#allocation4 + $0x314] ss:$8 sps:$4 sm:$0xff]   ;;  %v2846_v8 = vld [vmem:[#allocation4 + $0x210] ss:$8 sps:$4 sm:$0xff]  }
  0xa0   : > { %1366 = vmatprep.subr.bf16.mxu1 %v2770_v37  ;;  %v398_v37 = vld [vmem:[%s3368_s19 + $0x108] sm:$0xff]  ;;  %v2849_v9 = vld [vmem:[#allocation4 + $0x310] ss:$8 sps:$4 sm:$0xff]  }
  0xa1   : > { %v431_v25 = vld [vmem:[%s3368_s19 + $0x210] sm:$0xff] }
  0xa2   : > { %1284 = vmatpush2.bf16.msra.mxu0 %v2772_v38  ;;  %v406_v38 = vld [vmem:[%s3368_s19 + $0x148] sm:$0xff]  ;;  %v2858_v28 = vld [vmem:[#allocation4 + $0x2f0] ss:$8 sps:$4 sm:$0xff]  }
  0xa3   : > { %1367 = vmatpush2.bf16.msra.mxu1 %v2773_v39  ;;  %1285 = vmatprep.subr.bf16.mxu0 %v2774_v40  ;;  %v2833_v39 = vld [vmem:[#allocation4 + $0x344] ss:$8 sps:$4 sm:$0xff]   ;;  %v400_v40 = vld [vmem:[%s3368_s19 + $0x118] sm:$0xff] }
  0xa4   : > { %1368 = vmatprep.subr.bf16.mxu1 %v2776_v41  ;;  %v408_v41 = vld [vmem:[%s3368_s19 + $0x158] sm:$0xff] }
  0xa5   : > { %v464_v46 = vpack.c.bf16 %v408_v41, %v400_v40  ;;  %v2861_v29 = vld [vmem:[#allocation4 + $0x3f0] ss:$8 sps:$4 sm:$0xff]  }
  0xa6   : > { %1286 = vmatpush2.bf16.msra.mxu0 %v2778_v42  ;;  %v2828_v42 = vld [vmem:[#allocation4 + $0x240] ss:$8 sps:$4 sm:$0xff]  }
  0xa7   : > { %1369 = vmatpush2.bf16.msra.mxu1 %v2779_v43  ;;  %1287 = vmatprep.subr.bf16.mxu0 %v2780_v44  ;;  %v2831_v43 = vld [vmem:[#allocation4 + $0x340] ss:$8 sps:$4 sm:$0xff]   ;;  %v462_v44 = vpack.c.bf16 %v406_v38, %v398_v37  ;;  %v380_v37 = vld [vmem:[%s3368_s19 + $0x78] sm:$0xff] }
  0xa8   : > { %1370 = vmatprep.subr.bf16.mxu1 %v2782_v45  ;;  %v397_v45 = vld [vmem:[%s3368_s19 + $0x100] sm:$0xff] }
  0xa9   : > { %v461_v54 = vpack.c.bf16 %v405_v48, %v397_v45  ;;  %v2864_v38 = vld [vmem:[#allocation4 + $0x2e0] ss:$8 sps:$4 sm:$0xff]   ;;  %v2873_v45 = vld [vmem:[#allocation4 + $0x3d0] ss:$8 sps:$4 sm:$0xff]  }
  0xaa   : > { %1288 = vmatpush2.bf16.msra.mxu0 %v2784_v50  ;;  %v407_v50 = vld [vmem:[%s3368_s19 + $0x150] sm:$0xff]  ;;  %v2876_v48 = vld [vmem:[#allocation4 + $0x2c0] ss:$8 sps:$4 sm:$0xff]  }
  0xab   : > { %1371 = vmatpush2.bf16.msra.mxu1 %v2785_v51  ;;  %1289 = vmatprep.subr.bf16.mxu0 %v2786_v52  ;;  %v2839_v51 = vld [vmem:[#allocation4 + $0x334] ss:$8 sps:$4 sm:$0xff]   ;;  %v2834_v52 = vld [vmem:[#allocation4 + $0x230] ss:$8 sps:$4 sm:$0xff]  }
  0xac   : > { %1372 = vmatprep.subr.bf16.mxu1 %v2788_v55  ;;  %v463_v55 = vpack.c.bf16 %v407_v50, %v399_v49  ;;  %v2879_v49 = vld [vmem:[#allocation4 + $0x3c0] ss:$8 sps:$4 sm:$0xff]   ;;  %v2884_v50 = vld [vmem:[#allocation4 + $0x2b4] ss:$8 sps:$4 sm:$0xff]  }
  0xae   : > { %1290 = vmatpush2.bf16.msra.mxu0 %v2790_v56  ;;  %v2842_v56 = vld [vmem:[#allocation4 + $0x224] ss:$8 sps:$4 sm:$0xff]  }
  0xaf   : > { %1373 = vmatpush2.bf16.msra.mxu1 %v2791_v57  ;;  %1291 = vmatprep.subr.bf16.mxu0 %v2792_v58  ;;  %v414_v57 = vld [vmem:[%s3368_s19 + $0x188] sm:$0xff] }
  0xb0   : > { %1374 = vmatprep.subr.bf16.mxu1 %v2794_v59  ;;  %v422_v58 = vld [vmem:[%s3368_s19 + $0x1c8] sm:$0xff] }
  0xb1   : > { %v2845_v59 = vld [vmem:[#allocation4 + $0x324] ss:$8 sps:$4 sm:$0xff]  }
  0xb2   : > { %1292 = vmatpush2.bf16.msra.mxu0 %v2796_v60  ;;  %v416_v60 = vld [vmem:[%s3368_s19 + $0x198] sm:$0xff] }
  0xb3   : > { %1375 = vmatpush2.bf16.msra.mxu1 %v2797_v61  ;;  %1293 = vmatprep.subr.bf16.mxu0 %v2798_v62  ;;  %v424_v61 = vld [vmem:[%s3368_s19 + $0x1d8] sm:$0xff]  ;;  %v2840_v62 = vld [vmem:[#allocation4 + $0x220] ss:$8 sps:$4 sm:$0xff]  }
  0xb4   : > { %1376 = vmatprep.subr.bf16.mxu1 %v2800_v63  ;;  %v2843_v63 = vld [vmem:[#allocation4 + $0x320] ss:$8 sps:$4 sm:$0xff]  }
  0xb6   : > { %1294 = vmatpush2.bf16.msra.mxu0 %v2802_v0  ;;  %v470_v0 = vpack.c.bf16 %v422_v58, %v414_v57  ;;  %v2891_v57 = vld [vmem:[#allocation4 + $0x3a0] ss:$8 sps:$4 sm:$0xff]   ;;  %v2896_v58 = vld [vmem:[#allocation4 + $0x294] ss:$8 sps:$4 sm:$0xff]  }
  0xb7   : > { %1377 = vmatpush2.bf16.msra.mxu1 %v2803_v1  ;;  %1295 = vmatprep.subr.bf16.mxu0 %v2804_v2  ;;  %v413_v1 = vld [vmem:[%s3368_s19 + $0x180] sm:$0xff]  ;;  %v472_v2 = vpack.c.bf16 %v424_v61, %v416_v60  ;;  %v2894_v60 = vld [vmem:[#allocation4 + $0x290] ss:$8 sps:$4 sm:$0xff]  }
  0xb8   : > { %1378 = vmatprep.subr.bf16.mxu1 %v2806_v3  ;;  %v2848_v3 = vld [vmem:[#allocation4 + $0x214] ss:$8 sps:$4 sm:$0xff]   ;;  %v2897_v61 = vld [vmem:[#allocation4 + $0x390] ss:$8 sps:$4 sm:$0xff]  }
  0xba   : > { %1296 = vmatpush2.bf16.msra.mxu0 %v2808_v4  ;;  %v421_v4 = vld [vmem:[%s3368_s19 + $0x1c0] sm:$0xff] }
  0xbb   : > { %1379 = vmatpush2.bf16.msra.mxu1 %v2809_v5  ;;  %1431 = vmatprep.subr.bf16.mxu0 %v2812_v10  ;;  %v415_v5 = vld [vmem:[%s3368_s19 + $0x190] sm:$0xff]  ;;  %v469_v10 = vpack.c.bf16 %v421_v4, %v413_v1  ;;  %v2903_v1 = vld [vmem:[#allocation4 + $0x380] ss:$8 sps:$4 sm:$0xff]  }
  0xbc   : > { %1514 = vmatprep.subr.bf16.mxu1 %v2815_v11  ;;  %v471_v11 = vpack.c.bf16 %v423_v6, %v415_v5  ;;  %v371_v4 = vld [vmem:[%s3368_s19 + $0x30] sm:$0xff]  ;;  %v386_v6 = vld [vmem:[%s3368_s19 + $0xa8] sm:$0xff] }
  0xbd   : > { %1298 = vmatmul.mubr.bf16.vlgmr.msra.gmra.mxu0 %v445_v12  ;;  %v2854_v12 = vld [vmem:[#allocation4 + $0x204] ss:$8 sps:$4 sm:$0xff]   ;;  %v379_v5 = vld [vmem:[%s3368_s19 + $0x70] sm:$0xff] }
  0xbe   : > { %1381 = vmatmul.mubr.bf16.vlgmr.msra.gmra.mxu1 %v447_v13  ;;  %1432 = vmatpush1.bf16.msra.mxu0 %v2810_v14  ;;  %v430_v13 = vld [vmem:[%s3368_s19 + $0x208] sm:$0xff] }
  0xbf   : > { %1515 = vmatpush1.bf16.msra.mxu1 %v2813_v15  ;;  %1433 = vmatprep.subr.bf16.mxu0 %v2818_v16  ;;  %v438_v14 = vld [vmem:[%s3368_s19 + $0x248] sm:$0xff]  ;;  %v432_v16 = vld [vmem:[%s3368_s19 + $0x218] sm:$0xff] }
  0xc0   : > { %1516 = vmatprep.subr.bf16.mxu1 %v2821_v19  ;;  %1307 = vmatprep.mubr.bf16.mxu0 %v454_v24  ;;  %v2857_v15 = vld [vmem:[#allocation4 + $0x304] ss:$8 sps:$4 sm:$0xff]   ;;  %v2855_v19 = vld [vmem:[#allocation4 + $0x300] ss:$8 sps:$4 sm:$0xff]   ;;  %v478_v20 = vpack.c.bf16 %v438_v14, %v430_v13 }
  0xc1   : > { %1390 = vmatprep.mubr.bf16.mxu1 %v456_v26  ;;  %v437_v24 = vld [vmem:[%s3368_s19 + $0x240] sm:$0xff]  ;;  %v439_v26 = vld [vmem:[%s3368_s19 + $0x250] sm:$0xff] }
  0xc2   : > { %1434 = vmatpush1.bf16.msra.mxu0 %v2816_v22  ;;  %v480_v22 = vpack.c.bf16 %v440_v17, %v432_v16  ;;  %v477_v30 = vpack.c.bf16 %v437_v24, %v429_v21  ;;  %v385_v14 = vld [vmem:[%s3368_s19 + $0xa0] sm:$0xff]  ;;  %v387_v16 = vld [vmem:[%s3368_s19 + $0xb0] sm:$0xff]  ;;  %v412_v21 = vld [vmem:[%s3368_s19 + $0x178] sm:$0xff] }
  0xc3   : > { %1517 = vmatpush1.bf16.msra.mxu1 %v2819_v23  ;;  %1435 = vmatprep.subr.bf16.mxu0 %v2824_v27  ;;  %v2860_v23 = vld [vmem:[#allocation4 + $0x2f4] ss:$8 sps:$4 sm:$0xff]  }
  0xc4   : > { %1518 = vmatprep.subr.bf16.mxu1 %v2827_v31  ;;  %v2863_v27 = vld [vmem:[#allocation4 + $0x3f4] ss:$8 sps:$4 sm:$0xff]   ;;  %v479_v31 = vpack.c.bf16 %v439_v26, %v431_v25  ;;  %v401_v26 = vld [vmem:[%s3368_s19 + $0x120] sm:$0xff] }
  0xc5   : > { %1308 = vmatmul.mubr.bf16.gmra.mxu0 %v453_v34  ;;  %v370_v34 = vld [vmem:[%s3368_s19 + $0x28] sm:$0xff]  ;;  %v395_v17 = vld [vmem:[%s3368_s19 + $0xf0] sm:$0xff] }
  0xc6   : > { %1391 = vmatmul.mubr.bf16.gmra.mxu1 %v455_v35  ;;  %1436 = vmatpush1.bf16.msra.mxu0 %v2822_v32  ;;  %v2866_v32 = vld [vmem:[#allocation4 + $0x2e4] ss:$8 sps:$4 sm:$0xff]  }
  0xc7   : > { %1519 = vmatpush1.bf16.msra.mxu1 %v2825_v33  ;;  %1437 = vmatprep.subr.bf16.mxu0 %v2830_v36  ;;  %v2869_v33 = vld [vmem:[#allocation4 + $0x3e4] ss:$8 sps:$4 sm:$0xff]   ;;  %v372_v36 = vld [vmem:[%s3368_s19 + $0x38] sm:$0xff] }
  0xc8   : > { %1520 = vmatprep.subr.bf16.mxu1 %v2833_v39  ;;  %1317 = vmatprep.mubr.bf16.mxu0 %v462_v44  ;;  %v378_v35 = vld [vmem:[%s3368_s19 + $0x68] sm:$0xff]  ;;  %v452_v41 = vpack.c.bf16 %v380_v37, %v372_v36  ;;  %v2870_v44 = vld [vmem:[#allocation4 + $0x2d0] ss:$8 sps:$4 sm:$0xff]  }
  0xc9   : > { %1400 = vmatprep.mubr.bf16.mxu1 %v464_v46  ;;  %v2867_v39 = vld [vmem:[#allocation4 + $0x3e0] ss:$8 sps:$4 sm:$0xff]   ;;  %v450_v40 = vpack.c.bf16 %v378_v35, %v370_v34  ;;  %v2878_v46 = vld [vmem:[#allocation4 + $0x2c4] ss:$8 sps:$4 sm:$0xff]  }
  0xca   : > { %1438 = vmatpush1.bf16.msra.mxu0 %v2828_v42  ;;  %v2872_v42 = vld [vmem:[#allocation4 + $0x2d4] ss:$8 sps:$4 sm:$0xff]  }
  0xcb   : > { %1521 = vmatpush1.bf16.msra.mxu1 %v2831_v43  ;;  %1439 = vmatprep.subr.bf16.mxu0 %v2836_v47  ;;  %v2875_v43 = vld [vmem:[#allocation4 + $0x3d4] ss:$8 sps:$4 sm:$0xff]   ;;  %v2881_v47 = vld [vmem:[#allocation4 + $0x3c4] ss:$8 sps:$4 sm:$0xff]  }
  0xcc   : > { %1522 = vmatprep.subr.bf16.mxu1 %v2839_v51  ;;  %v2887_v51 = vld [vmem:[#allocation4 + $0x3b4] ss:$8 sps:$4 sm:$0xff]  }
  0xcd   : > { %1318 = vmatmul.mubr.bf16.gmra.mxu0 %v461_v54  ;;  %v2890_v54 = vld [vmem:[#allocation4 + $0x2a4] ss:$8 sps:$4 sm:$0xff]  }
  0xce   : > { %1401 = vmatmul.mubr.bf16.gmra.mxu1 %v463_v55  ;;  %1440 = vmatpush1.bf16.msra.mxu0 %v2834_v52  ;;  %v2882_v52 = vld [vmem:[#allocation4 + $0x2b0] ss:$8 sps:$4 sm:$0xff]   ;;  %v2893_v55 = vld [vmem:[#allocation4 + $0x3a4] ss:$8 sps:$4 sm:$0xff]  }
  0xcf   : > { %1523 = vmatpush1.bf16.msra.mxu1 %v2837_v53  ;;  %1441 = vmatprep.subr.bf16.mxu0 %v2842_v56  ;;  %v2885_v53 = vld [vmem:[#allocation4 + $0x3b0] ss:$8 sps:$4 sm:$0xff]   ;;  %v2888_v56 = vld [vmem:[#allocation4 + $0x2a0] ss:$8 sps:$4 sm:$0xff]  }
  0xd0   : > { %1524 = vmatprep.subr.bf16.mxu1 %v2845_v59  ;;  %1327 = vmatprep.mubr.bf16.mxu0 %v470_v0  ;;  %v2899_v59 = vld [vmem:[#allocation4 + $0x394] ss:$8 sps:$4 sm:$0xff]   ;;  %v2900_v0 = vld [vmem:[#allocation4 + $0x280] ss:$8 sps:$4 sm:$0xff]  }
  0xd1   : > { %1410 = vmatprep.mubr.bf16.mxu1 %v472_v2  ;;  %v369_v2 = vld [vmem:[%s3368_s19 + $0x20] sm:$0xff] }
  0xd2   : > { %1442 = vmatpush1.bf16.msra.mxu0 %v2840_v62  ;;  %v2902_v62 = vld [vmem:[#allocation4 + $0x284] ss:$8 sps:$4 sm:$0xff]  }
  0xd3   : > { %1525 = vmatpush1.bf16.msra.mxu1 %v2843_v63  ;;  %1443 = vmatprep.subr.bf16.mxu0 %v2848_v3  ;;  %v2905_v63 = vld [vmem:[#allocation4 + $0x384] ss:$8 sps:$4 sm:$0xff]  }
  0xd4   : > { %1526 = vmatprep.subr.bf16.mxu1 %v2851_v7  ;;  %v377_v3 = vld [vmem:[%s3368_s19 + $0x60] sm:$0xff]  ;;  %v394_v7 = vld [vmem:[%s3368_s19 + $0xe8] sm:$0xff] }
  0xd5   : > { %1328 = vmatmul.mubr.bf16.gmra.mxu0 %v469_v10  ;;  %v449_v10 = vpack.c.bf16 %v377_v3, %v369_v2  ;;  %v2916_v2 = vld [vmem:[%s3737_s3 + $0x50] sm:$0xff]  }
  0xd6   : > { %1411 = vmatmul.mubr.bf16.gmra.mxu1 %v471_v11  ;;  %1444 = vmatpush1.bf16.msra.mxu0 %v2846_v8  ;;  %v388_v8 = vld [vmem:[%s3368_s19 + $0xb8] sm:$0xff]  ;;  %v451_v11 = vpack.c.bf16 %v379_v5, %v371_v4  ;;  %v2917_v3 = vld [vmem:[%s3737_s3 + $0x10] sm:$0xff]   ;;  %v2918_v4 = vld [vmem:[%s3737_s3 + $0x48] sm:$0xff]  }
  0xd7   : > { %1527 = vmatpush1.bf16.msra.mxu1 %v2849_v9  ;;  %1445 = vmatprep.subr.bf16.mxu0 %v2854_v12  ;;  %v396_v9 = vld [vmem:[%s3368_s19 + $0xf8] sm:$0xff]  ;;  %v458_v12 = vpack.c.bf16 %v394_v7, %v386_v6  ;;  %v2919_v5 = vld [vmem:[%s3737_s3 + $0x8] sm:$0xff]   ;;  %v2920_v6 = vld [vmem:[%s3737_s3 + $0x40] sm:$0xff]  }
  0xd8   : > { %1528 = vmatprep.subr.bf16.mxu1 %v2857_v15  ;;  %1337 = vmatprep.mubr.bf16.mxu0 %v478_v20  ;;  %v460_v13 = vpack.c.bf16 %v396_v9, %v388_v8  ;;  %v393_v15 = vld [vmem:[%s3368_s19 + $0xe0] sm:$0xff]  ;;  %v404_v20 = vld [vmem:[%s3368_s19 + $0x138] sm:$0xff]  ;;  %v3177_v9 = vmov 0.0  }
  0xd9   : > { %1420 = vmatprep.mubr.bf16.mxu1 %v480_v22  ;;  %v457_v22 = vpack.c.bf16 %v393_v15, %v385_v14  ;;  %v468_v25 = vpack.c.bf16 %v412_v21, %v404_v20  ;;  %v2921_v7 = vld [vmem:[%s3737_s3] sm:$0xff]   ;;  %v2922_v8 = vld [vmem:[%s3739_s5 + $0x18] sm:$0xff]  }
  0xda   : > { %1446 = vmatpush1.bf16.msra.mxu0 %v2852_v18  ;;  %v402_v18 = vld [vmem:[%s3368_s19 + $0x128] sm:$0xff] }
  0xdb   : > { %1529 = vmatpush1.bf16.msra.mxu1 %v2855_v19  ;;  %1447 = vmatprep.subr.bf16.mxu0 %v2860_v23  ;;  %v410_v19 = vld [vmem:[%s3368_s19 + $0x168] sm:$0xff]  ;;  %v459_v23 = vpack.c.bf16 %v395_v17, %v387_v16 }
  0xdc   : > { %1530 = vmatprep.subr.bf16.mxu1 %v2863_v27  ;;  %v466_v24 = vpack.c.bf16 %v410_v19, %v402_v18  ;;  %v409_v27 = vld [vmem:[%s3368_s19 + $0x160] sm:$0xff] }
  0xdd   : > { %1338 = vmatmul.mubr.bf16.gmra.mxu0 %v477_v30  ;;  %v418_v30 = vld [vmem:[%s3368_s19 + $0x1a8] sm:$0xff]  ;;  %v465_v34 = vpack.c.bf16 %v409_v27, %v401_v26 }
  0xde   : > { %1421 = vmatmul.mubr.bf16.gmra.mxu1 %v479_v31  ;;  %1448 = vmatpush2.bf16.msra.mxu0 %v2858_v28  ;;  %v403_v28 = vld [vmem:[%s3368_s19 + $0x130] sm:$0xff]  ;;  %v426_v31 = vld [vmem:[%s3368_s19 + $0x1e8] sm:$0xff] }
  0xdf   : > { %1531 = vmatpush2.bf16.msra.mxu1 %v2861_v29  ;;  %1449 = vmatprep.subr.bf16.mxu0 %v2866_v32  ;;  %v411_v29 = vld [vmem:[%s3368_s19 + $0x170] sm:$0xff]  ;;  %v420_v32 = vld [vmem:[%s3368_s19 + $0x1b8] sm:$0xff]  ;;  %v474_v36 = vpack.c.bf16 %v426_v31, %v418_v30 }
  0xe0   : > { %1532 = vmatprep.subr.bf16.mxu1 %v2869_v33  ;;  %1463 = vmatprep.mubr.bf16.mxu0 %v450_v40  ;;  %v428_v33 = vld [vmem:[%s3368_s19 + $0x1f8] sm:$0xff]  ;;  %v467_v35 = vpack.c.bf16 %v411_v29, %v403_v28  ;;  %v419_v40 = vld [vmem:[%s3368_s19 + $0x1b0] sm:$0xff] }
  0xe1   : > { %1546 = vmatprep.mubr.bf16.mxu1 %v452_v41  ;;  %v476_v37 = vpack.c.bf16 %v428_v33, %v420_v32  ;;  %v427_v41 = vld [vmem:[%s3368_s19 + $0x1f0] sm:$0xff] }
  0xe2   : > { %1450 = vmatpush2.bf16.msra.mxu0 %v2864_v38  ;;  %v417_v38 = vld [vmem:[%s3368_s19 + $0x1a0] sm:$0xff] }
  0xe3   : > { %1533 = vmatpush2.bf16.msra.mxu1 %v2867_v39  ;;  %1451 = vmatprep.subr.bf16.mxu0 %v2872_v42  ;;  %v425_v39 = vld [vmem:[%s3368_s19 + $0x1e0] sm:$0xff]  ;;  %v434_v42 = vld [vmem:[%s3368_s19 + $0x228] sm:$0xff] }
  0xe4   : > { %1534 = vmatprep.subr.bf16.mxu1 %v2875_v43  ;;  %v442_v43 = vld [vmem:[%s3368_s19 + $0x268] sm:$0xff] }
  0xe6   : > { %1452 = vmatpush2.bf16.msra.mxu0 %v2870_v44  ;;  %v436_v44 = vld [vmem:[%s3368_s19 + $0x238] sm:$0xff] }
  0xe7   : > { %1535 = vmatpush2.bf16.msra.mxu1 %v2873_v45  ;;  %1453 = vmatprep.subr.bf16.mxu0 %v2878_v46  ;;  %v444_v45 = vld [vmem:[%s3368_s19 + $0x278] sm:$0xff]  ;;  %v473_v46 = vpack.c.bf16 %v425_v39, %v417_v38 }
  0xe8   : > { %1536 = vmatprep.subr.bf16.mxu1 %v2881_v47  ;;  %v475_v47 = vpack.c.bf16 %v427_v41, %v419_v40 }
  0xea   : > { %1454 = vmatpush2.bf16.msra.mxu0 %v2876_v48  ;;  %v482_v48 = vpack.c.bf16 %v442_v43, %v434_v42  ;;  %v615_v42 = vlaneseq }
  0xeb   : > { %1537 = vmatpush2.bf16.msra.mxu1 %v2879_v49  ;;  %1455 = vmatprep.subr.bf16.mxu0 %v2884_v50  ;;  %v484_v49 = vpack.c.bf16 %v444_v45, %v436_v44  ;;  %v2906_v50 = vld [vmem:[%s3737_s3 + $0x78] sm:$0xff]  }
  0xec   : > { %1538 = vmatprep.subr.bf16.mxu1 %v2887_v51  ;;  %v2907_v51 = vld [vmem:[%s3737_s3 + $0x38] sm:$0xff]   ;;  %v616_v45 = vshrl.u32 %v615_v42, 7 }
  0xee   : > { %1456 = vmatpush2.bf16.msra.mxu0 %v2882_v52  ;;  %v433_v52 = vld [vmem:[%s3368_s19 + $0x220] sm:$0xff] }
  0xef   : > { %1539 = vmatpush2.bf16.msra.mxu1 %v2885_v53  ;;  %1457 = vmatprep.subr.bf16.mxu0 %v2890_v54  ;;  %v441_v53 = vld [vmem:[%s3368_s19 + $0x260] sm:$0xff]  ;;  %v435_v54 = vld [vmem:[%s3368_s19 + $0x230] sm:$0xff] }
  0xf0   : > { %1540 = vmatprep.subr.bf16.mxu1 %v2893_v55  ;;  %v443_v55 = vld [vmem:[%s3368_s19 + $0x270] sm:$0xff] }
  0xf2   : > { %1458 = vmatpush2.bf16.msra.mxu0 %v2888_v56  ;;  %v2908_v56 = vld [vmem:[%s3737_s3 + $0x70] sm:$0xff]  }
  0xf3   : > { %1541 = vmatpush2.bf16.msra.mxu1 %v2891_v57  ;;  %1459 = vmatprep.subr.bf16.mxu0 %v2896_v58  ;;  %v2909_v57 = vld [vmem:[%s3737_s3 + $0x30] sm:$0xff]   ;;  %v481_v58 = vpack.c.bf16 %v441_v53, %v433_v52 }
  0xf4   : > { %1542 = vmatprep.subr.bf16.mxu1 %v2899_v59  ;;  %v483_v59 = vpack.c.bf16 %v443_v55, %v435_v54 }
  0xf6   : > { %1460 = vmatpush2.bf16.msra.mxu0 %v2894_v60  ;;  %v2910_v60 = vld [vmem:[%s3737_s3 + $0x68] sm:$0xff]  }
  0xf7   : > { %1543 = vmatpush2.bf16.msra.mxu1 %v2897_v61  ;;  %1461 = vmatprep.subr.bf16.mxu0 %v2902_v62  ;;  %v2911_v61 = vld [vmem:[%s3737_s3 + $0x28] sm:$0xff]   ;;  %v2912_v62 = vld [vmem:[%s3737_s3 + $0x60] sm:$0xff]  }
  0xf8   : > { %1544 = vmatprep.subr.bf16.mxu1 %v2905_v63  ;;  %v2913_v63 = vld [vmem:[%s3737_s3 + $0x20] sm:$0xff]  }
  0xfa   : > { %1462 = vmatpush2.bf16.msra.mxu0 %v2900_v0  ;;  %v2914_v0 = vld [vmem:[%s3737_s3 + $0x58] sm:$0xff]  }
  0xfb   : > { %1545 = vmatpush2.bf16.msra.mxu1 %v2903_v1  ;;  %2483 = vmatprep.subr.bf16.mxu0 %v2906_v50  ;;  %v2915_v1 = vld [vmem:[%s3737_s3 + $0x18] sm:$0xff]   ;;  %v617_v50 = vsub.s32 0, %v616_v45 }
  0xfc   : > { %2538 = vmatprep.subr.bf16.mxu1 %v3177_v9 }
  0xfd   : > { %1464 = vmatmul.mubr.bf16.vlgmr.msra.gmra.mxu0 %v449_v10  ;;  %v2923_v10 = vld [vmem:[%s3739_s5 + $0x10] sm:$0xff]  }
  0xfe   : > { %1547 = vmatmul.mubr.bf16.vlgmr.msra.gmra.mxu1 %v451_v11  ;;  %1473 = vmatprep.mubr.bf16.mxu0 %v458_v12  ;;  %v2924_v11 = vld [vmem:[%s3739_s5 + $0x8] sm:$0xff]  }
  0xff   : > { %1556 = vmatprep.mubr.bf16.mxu1 %v460_v13  ;;  %2484 = vmatpush3.bf16.msra.mxu0 %v2907_v51 }
 0x100   : > { %2485 = vmatprep.subr.bf16.mxu0 %v2908_v56  ;;  %2539 = vmatpush3.bf16.msra.mxu1 %v2922_v8 }
 0x101   : > { %2540 = vmatprep.subr.bf16.mxu1 %v3177_v9 }
 0x103   : > { %2486 = vmatpush3.bf16.msra.mxu0 %v2909_v57 }
 0x104   : > { %2487 = vmatprep.subr.bf16.mxu0 %v2910_v60  ;;  %2541 = vmatpush3.bf16.msra.mxu1 %v2923_v10 }
 0x105   : > { %1474 = vmatmul.mubr.bf16.gmra.mxu0 %v457_v22  ;;  %2542 = vmatprep.subr.bf16.mxu1 %v3177_v9 }
 0x106   : > { %1557 = vmatmul.mubr.bf16.gmra.mxu1 %v459_v23  ;;  %1483 = vmatprep.mubr.bf16.mxu0 %v466_v24 }
 0x107   : > { %1566 = vmatprep.mubr.bf16.mxu1 %v468_v25  ;;  %2488 = vmatpush3.bf16.msra.mxu0 %v2911_v61 }
 0x108   : > { %2489 = vmatprep.subr.bf16.mxu0 %v2912_v62  ;;  %2543 = vmatpush3.bf16.msra.mxu1 %v2924_v11 }
 0x109   : > { %2544 = vmatprep.subr.bf16.mxu1 %v3177_v9 }
 0x10b   : > { %2490 = vmatpush3.bf16.msra.mxu0 %v2913_v63 }
 0x10c   : > { %2491 = vmatprep.subr.bf16.mxu0 %v2914_v0 }
 0x10d   : > { %1484 = vmatmul.mubr.bf16.gmra.mxu0 %v465_v34 }
 0x10e   : > { %1567 = vmatmul.mubr.bf16.gmra.mxu1 %v467_v35  ;;  %1493 = vmatprep.mubr.bf16.mxu0 %v474_v36 }
 0x10f   : > { %1576 = vmatprep.mubr.bf16.mxu1 %v476_v37  ;;  %2492 = vmatpush3.bf16.msra.mxu0 %v2915_v1 }
 0x110   : > { %2493 = vmatprep.subr.bf16.mxu0 %v2916_v2 }
 0x113   : > { %2494 = vmatpush3.bf16.msra.mxu0 %v2917_v3 }
 0x114   : > { %2495 = vmatprep.subr.bf16.mxu0 %v2918_v4 }
 0x115   : > { %1494 = vmatmul.mubr.bf16.gmra.mxu0 %v473_v46 }
 0x116   : > { %1577 = vmatmul.mubr.bf16.gmra.mxu1 %v475_v47  ;;  %1503 = vmatprep.mubr.bf16.mxu0 %v482_v48  ;;  %v621_v48 = vsub.s32 1, %v616_v45 }
 0x117   : > { %1586 = vmatprep.mubr.bf16.mxu1 %v484_v49  ;;  %2496 = vmatpush3.bf16.msra.mxu0 %v2919_v5  ;;  %v613_v49 = vld [vmem:[#allocation6] sm:$0x3] }
 0x118   : > { %2497 = vmatprep.subr.bf16.mxu0 %v2920_v6  ;;  %v3571_v53 = vrot.slane %v613_v49, %v621_v48  ;;  %v3573_v54 = vrot.slane %v613_v49, %v617_v50 }
 0x11b   : > { %2498 = vmatpush3.bf16.msra.mxu0 %v2921_v7 }
 0x11d   : > { %1504 = vmatmul.mubr.bf16.gmra.mxu0 %v481_v58 }
 0x11e   : > { %1587 = vmatmul.mubr.bf16.gmra.mxu1 %v483_v59 }
 0x11f   : > { %2546 = vmatprep.mubr.msk.bf16.mxu1 %vm3178_vm0, %v3177_v9 }
 0x17d   : > { %v1299_v12 = vpop.f32.mrf.mxu0 }
 0x17e   : > { %v1382_v13 = vpop.f32.mrf.mxu1  ;;  %v1300_v58 = vadd.f32 %v1299_v12, %v3573_v54 }
 0x17f   : > { %v1301_v14 = vpop.f32.mrf.mxu0 }
 0x180   : > { %v1384_v15 = vpop.f32.mrf.mxu1  ;;  %v1302_v57 = vadd.f32 %v1301_v14, %v3571_v53  ;;  %v1383_v2 = vadd.f32 %v1382_v13, %v1300_v58 }
 0x181   : > { %v1303_v16 = vpop.f32.mrf.mxu0 }
 0x182   : > { %v1386_v17 = vpop.f32.mrf.mxu1  ;;  %v1304_v61 = vadd.f32 %v1303_v16, %v3573_v54  ;;  %v1385_v0 = vadd.f32 %v1384_v15, %v1302_v57 }
 0x183   : > { %v1305_v18 = vpop.f32.mrf.mxu0 }
 0x184   : > { %v1388_v19 = vpop.f32.mrf.mxu1  ;;  %v1306_v1 = vadd.f32 %v1305_v18, %v3571_v53  ;;  %v1387_v5 = vadd.f32 %v1386_v17, %v1304_v61 }
 0x185   : > { %v1309_v20 = vpop.f32.mrf.mxu0 }
 0x186   : > { %v3523_v21 = vpop.f32.mrf.mxu1  ;;  %v1389_v11 = vadd.f32 %v1388_v19, %v1306_v1  ;;  %v1310_v42 = vadd.f32 %v1309_v20, %v3573_v54 }
 0x187   : > { %v1311_v22 = vpop.f32.mrf.mxu0 }
 0x188   : > { %v3525_v23 = vpop.f32.mrf.mxu1  ;;  %v1312_v12 = vadd.f32 %v1311_v22, %v3571_v53  ;;  %v1393_v22 = vadd.f32 %v3523_v21, %v1310_v42 }
 0x189   : > { %v1313_v24 = vpop.f32.mrf.mxu0 }
 0x18a   : > { %v3527_v25 = vpop.f32.mrf.mxu1  ;;  %v1314_v15 = vadd.f32 %v1313_v24, %v3573_v54  ;;  %v1395_v57 = vadd.f32 %v3525_v23, %v1312_v12 }
 0x18b   : > { %v1315_v26 = vpop.f32.mrf.mxu0 }
 0x18c   : > { %v3529_v27 = vpop.f32.mrf.mxu1  ;;  %v1316_v58 = vadd.f32 %v1315_v26, %v3571_v53 }
 0x18d   : > { %v3531_v28 = vpop.f32.mrf.mxu0 }
 0x18e   : > { %v3533_v29 = vpop.f32.mrf.mxu1  ;;  %v1320_v21 = vadd.f32 %v3531_v28, %v3573_v54 }
 0x18f   : > { %v3535_v30 = vpop.f32.mrf.mxu0 }
 0x190   : > { %v3537_v31 = vpop.f32.mrf.mxu1  ;;  %v1322_v23 = vadd.f32 %v3535_v30, %v3571_v53 }
 0x191   : > { %v3539_v32 = vpop.f32.mrf.mxu0 }
 0x192   : > { %v3541_v33 = vpop.f32.mrf.mxu1  ;;  %v1405_v30 = vadd.f32 %v3537_v31, %v1322_v23 }
 0x193   : > { %v3543_v34 = vpop.f32.mrf.mxu0 }
 0x194   : > { %v3545_v35 = vpop.f32.mrf.mxu1 }
 0x195   : > { %v3547_v36 = vpop.f32.mrf.mxu0 }
 0x196   : > { %v3549_v37 = vpop.f32.mrf.mxu1 }
 0x197   : > { %v3551_v38 = vpop.f32.mrf.mxu0 }
 0x198   : > { %v3553_v39 = vpop.f32.mrf.mxu1 }
 0x199   : > { %v3555_v40 = vpop.f32.mrf.mxu0 }
 0x19a   : > { %v3557_v41 = vpop.f32.mrf.mxu1 }
 0x19b   : > { %v3559_v43 = vpop.f32.mrf.mxu0 }
 0x19c   : > { %v3561_v44 = vpop.f32.mrf.mxu1 }
 0x19d   : > { %v3563_v46 = vpop.f32.mrf.mxu0 }
 0x19e   : > { %v3565_v47 = vpop.f32.mrf.mxu1 }
 0x19f   : > { %v3567_v51 = vpop.f32.mrf.mxu0 }
 0x1a0   : > { %v3569_v52 = vpop.f32.mrf.mxu1 }
 0x1a1   : > { %v3575_v55 = vpop.f32.mrf.mxu0 }
 0x1a2   : > { %v3577_v56 = vpop.f32.mrf.mxu1 }
 0x1a3   : > { %v3581_v59 = vpop.f32.mrf.mxu0 }
 0x1a4   : > { %v3583_v60 = vpop.f32.mrf.mxu1 }
 0x1bd   : > { %v1465_v62 = vpop.f32.mrf.mxu0 }
 0x1be   : > { %v1548_v63 = vpop.f32.mrf.mxu1  ;;  %v1466_v7 = vadd.f32 %v1465_v62, %v1383_v2 }
 0x1bf   : > { %v1467_v3 = vpop.f32.mrf.mxu0 }
 0x1c0   : > { %v1550_v4 = vpop.f32.mrf.mxu1  ;;  %v1468_v6 = vadd.f32 %v1467_v3, %v1385_v0  ;;  %v1549_v49 = vadd.f32 %v1548_v63, %v1466_v7  ;;  %v1397_v0 = vadd.f32 %v3527_v25, %v1314_v15  ;;  %v1326_v15 = vadd.f32 %v3543_v34, %v3571_v53 }
 0x1c1   : > { %v1469_v8 = vpop.f32.mrf.mxu0  ;;  %v1332_v34 = vadd.f32 %v3551_v38, %v3571_v53 }
 0x1c2   : > { %v1552_v10 = vpop.f32.mrf.mxu1  ;;  %v1470_v14 = vadd.f32 %v1469_v8, %v1387_v5  ;;  %v1551_v48 = vadd.f32 %v1550_v4, %v1468_v6  ;;  %v1597_v3 = vmax.f32 %v1549_v49, 0.0  ;;  %v1399_v6 = vadd.f32 %v3529_v27, %v1316_v58 }
 0x1c3   : > { %v1471_v16 = vpop.f32.mrf.mxu0  ;;  %v1409_v31 = vadd.f32 %v3545_v35, %v1326_v15  ;;  %v1415_v38 = vadd.f32 %v3553_v39, %v1332_v34  ;;  %v1344_v15 = vadd.f32 %v3575_v55, %v3573_v54 }
 0x1c4   : > { %v1554_v45 = vpop.f32.mrf.mxu1  ;;  %v1553_v18 = vadd.f32 %v1552_v10, %v1470_v14  ;;  %v1472_v13 = vadd.f32 %v1471_v16, %v1389_v11  ;;  %v1598_v1 = vmax.f32 %v1551_v48, 0.0  ;;  %v1324_v11 = vadd.f32 %v3539_v32, %v3573_v54 }
 0x1c5   : > { %v1475_v50 = vpop.f32.mrf.mxu0  ;;  %v1403_v48 = vadd.f32 %v3533_v29, %v1320_v21  ;;  %v1330_v29 = vadd.f32 %v3547_v36, %v3573_v54 }
 0x1c6   : > { %v1558_v17 = vpop.f32.mrf.mxu1  ;;  %v1555_v19 = vadd.f32 %v1554_v45, %v1472_v13  ;;  %v1599_v61 = vmax.f32 %v1553_v18, 0.0  ;;  %v1476_v4 = vadd.f32 %v1475_v50, %v1393_v22  ;;  %v1407_v32 = vadd.f32 %v3541_v33, %v1324_v11 }
 0x1c7   : > { %v1477_v62 = vpop.f32.mrf.mxu0  ;;  %v1413_v23 = vadd.f32 %v3549_v37, %v1330_v29  ;;  %v1340_v37 = vadd.f32 %v3563_v46, %v3573_v54 }
 0x1c8   : > { %v1560_v20 = vpop.f32.mrf.mxu1  ;;  %v1600_v24 = vmax.f32 %v1555_v19, 0.0  ;;  %v1478_v2 = vadd.f32 %v1477_v62, %v1395_v57  ;;  %v1617_v8 = vpack.c.bf16 %v1599_v61, %v1597_v3  ;;  %v1559_v16 = vadd.f32 %v1558_v17, %v1476_v4 }
 0x1c9   : > { %v1479_v63 = vpop.f32.mrf.mxu0 }
 0x1ca   : > { %v1562_v5 = vpop.f32.mrf.mxu1  ;;  %v1618_v26 = vpack.c.bf16 %v1600_v24, %v1598_v1  ;;  %v1480_v7 = vadd.f32 %v1479_v63, %v1397_v0  ;;  %v1561_v12 = vadd.f32 %v1560_v20, %v1478_v2  ;;  %v1601_v17 = vmax.f32 %v1559_v16, 0.0 }
 0x1cb   : > { %v1481_v10 = vpop.f32.mrf.mxu0  ;;  %v1334_v24 = vadd.f32 %v3555_v40, %v3573_v54  ;;  %v1427_v54 = vadd.f32 %v3577_v56, %v1344_v15 }
 0x1cc   : > { %v1564_v25 = vpop.f32.mrf.mxu1  ;;  %v1563_v14 = vadd.f32 %v1562_v5, %v1480_v7  ;;  %v1482_v42 = vadd.f32 %v1481_v10, %v1399_v6  ;;  %1794 = vmatprep.mubr.bf16.mxu0 %v1618_v26  ;;  %v1602_v50 = vmax.f32 %v1561_v12, 0.0  ;;  %v1336_v6 = vadd.f32 %v3559_v43, %v3571_v53 }
 0x1cd   : > { %v1485_v27 = vpop.f32.mrf.mxu0  ;;  %1795 = vmatmul.mubr.bf16.vlgmr.msra.gmra.mxu0 %v1617_v8  ;;  %v1417_v40 = vadd.f32 %v3557_v41, %v1334_v24  ;;  %v1342_v43 = vadd.f32 %v3567_v51, %v3571_v53 }
 0x1ce   : > { %v1568_v45 = vpop.f32.mrf.mxu1  ;;  %v1565_v28 = vadd.f32 %v1564_v25, %v1482_v42  ;;  %v1603_v18 = vmax.f32 %v1563_v14, 0.0  ;;  %v1486_v19 = vadd.f32 %v1485_v27, %v1403_v48  ;;  %v1419_v39 = vadd.f32 %v3561_v44, %v1336_v6 }
 0x1cf   : > { %v1487_v13 = vpop.f32.mrf.mxu0  ;;  %v1425_v51 = vadd.f32 %v3569_v52, %v1342_v43 }
 0x1d0   : > { %v1570_v49 = vpop.f32.mrf.mxu1  ;;  %v1604_v57 = vmax.f32 %v1565_v28, 0.0  ;;  %v1488_v58 = vadd.f32 %v1487_v13, %v1405_v30  ;;  %v1619_v0 = vpack.c.bf16 %v1603_v18, %v1601_v17  ;;  %v1569_v63 = vadd.f32 %v1568_v45, %v1486_v19 }
 0x1d1   : > { %v1489_v22 = vpop.f32.mrf.mxu0 }
 0x1d2   : > { %v1572_v61 = vpop.f32.mrf.mxu1  ;;  %v1620_v62 = vpack.c.bf16 %v1604_v57, %v1602_v50  ;;  %v1490_v20 = vadd.f32 %v1489_v22, %v1407_v32  ;;  %v1571_v2 = vadd.f32 %v1570_v49, %v1488_v58  ;;  %v1605_v11 = vmax.f32 %v1569_v63, 0.0 }
 0x1d3   : > { %v1491_v1 = vpop.f32.mrf.mxu0  ;;  %v1346_v32 = vadd.f32 %v3581_v59, %v3571_v53  ;;  %v1423_v50 = vadd.f32 %v3565_v47, %v1340_v37 }
 0x1d4   : > { %v1574_v33 = vpop.f32.mrf.mxu1  ;;  %v1573_v3 = vadd.f32 %v1572_v61, %v1490_v20  ;;  %v1492_v4 = vadd.f32 %v1491_v1, %v1409_v31  ;;  %1802 = vmatprep.mubr.bf16.mxu0 %v1620_v62  ;;  %v1606_v8 = vmax.f32 %v1571_v2, 0.0 }
 0x1d5   : > { %v1495_v35 = vpop.f32.mrf.mxu0  ;;  %1803 = vmatmul.mubr.bf16.gmra.mxu0 %v1619_v0  ;;  %v1429_v52 = vadd.f32 %v3583_v60, %v1346_v32  ;;  %v2925_v60 = vld [vmem:[%s3739_s5] sm:$0xff]  }
 0x1d6   : > { %v1578_v5 = vpop.f32.mrf.mxu1  ;;  %v1575_v36 = vadd.f32 %v1574_v33, %v1492_v4  ;;  %v1607_v26 = vmax.f32 %v1573_v3, 0.0  ;;  %v1496_v12 = vadd.f32 %v1495_v35, %v1413_v23  ;;  %2545 = vmatpush3.bf16.msra.mxu1 %v2925_v60  ;;  %v2439_v23 = vld [vmem:[#allocation7] ss:$0 sm:$0xff] }
 0x1d7   : > { %v1497_v7 = vpop.f32.mrf.mxu0 }
 0x1d8   : > { %v1580_v21 = vpop.f32.mrf.mxu1  ;;  %v1608_v10 = vmax.f32 %v1575_v36, 0.0  ;;  %v1498_v25 = vadd.f32 %v1497_v7, %v1415_v38  ;;  %v1621_v45 = vpack.c.bf16 %v1607_v26, %v1605_v11  ;;  %v1579_v13 = vadd.f32 %v1578_v5, %v1496_v12 }
 0x1d9   : > { %v1499_v14 = vpop.f32.mrf.mxu0 }
 0x1da   : > { %v1582_v42 = vpop.f32.mrf.mxu1  ;;  %v1622_v16 = vpack.c.bf16 %v1608_v10, %v1606_v8  ;;  %v1500_v27 = vadd.f32 %v1499_v14, %v1417_v40  ;;  %v1581_v28 = vadd.f32 %v1580_v21, %v1498_v25  ;;  %v1609_v61 = vmax.f32 %v1579_v13, 0.0 }
 0x1db   : > { %v1501_v30 = vpop.f32.mrf.mxu0 }
 0x1dc   : > { %v1584_v41 = vpop.f32.mrf.mxu1  ;;  %v1583_v48 = vadd.f32 %v1582_v42, %v1500_v27  ;;  %v1502_v18 = vadd.f32 %v1501_v30, %v1419_v39  ;;  %1810 = vmatprep.mubr.bf16.mxu0 %v1622_v16  ;;  %v1610_v55 = vmax.f32 %v1581_v28, 0.0 }
 0x1dd   : > { %v1505_v44 = vpop.f32.mrf.mxu0  ;;  %1811 = vmatmul.mubr.bf16.gmra.mxu0 %v1621_v45 }
 0x1de   : > { %v1588_v49 = vpop.f32.mrf.mxu1  ;;  %v1585_v46 = vadd.f32 %v1584_v41, %v1502_v18  ;;  %v1611_v57 = vmax.f32 %v1583_v48, 0.0  ;;  %v1506_v31 = vadd.f32 %v1505_v44, %v1423_v50 }
 0x1df   : > { %v1507_v58 = vpop.f32.mrf.mxu0 }
 0x1e0   : > { %v1590_v17 = vpop.f32.mrf.mxu1  ;;  %v1612_v19 = vmax.f32 %v1585_v46, 0.0  ;;  %v1508_v22 = vadd.f32 %v1507_v58, %v1425_v51  ;;  %v1623_v53 = vpack.c.bf16 %v1611_v57, %v1609_v61  ;;  %v1589_v33 = vadd.f32 %v1588_v49, %v1506_v31 }
 0x1e1   : > { %v1509_v34 = vpop.f32.mrf.mxu0 }
 0x1e2   : > { %v1592_v62 = vpop.f32.mrf.mxu1  ;;  %v1624_v20 = vpack.c.bf16 %v1612_v19, %v1610_v55  ;;  %v1510_v29 = vadd.f32 %v1509_v34, %v1427_v54  ;;  %v1591_v0 = vadd.f32 %v1590_v17, %v1508_v22  ;;  %v1613_v63 = vmax.f32 %v1589_v33, 0.0 }
 0x1e3   : > { %v1511_v59 = vpop.f32.mrf.mxu0 }
 0x1e4   : > { %v1593_v47 = vadd.f32 %v1592_v62, %v1510_v29  ;;  %v1512_v1 = vadd.f32 %v1511_v59, %v1429_v52  ;;  %1818 = vmatprep.mubr.bf16.mxu0 %v1624_v20  ;;  %v1594_v24 = vpop.f32.mrf.mxu1  ;;  %v1614_v3 = vmax.f32 %v1591_v0, 0.0 }
 0x1e5   : > { %1819 = vmatmul.mubr.bf16.gmra.mxu0 %v1623_v53 }
 0x1e6   : > { %v1595_v56 = vadd.f32 %v1594_v24, %v1512_v1  ;;  %v1615_v2 = vmax.f32 %v1593_v47, 0.0 }
 0x1e8   : > { %v1616_v4 = vmax.f32 %v1595_v56, 0.0  ;;  %v1625_v5 = vpack.c.bf16 %v1615_v2, %v1613_v63  ;;  %v2456_v2 = vld [vmem:[#allocation9] ss:$0 sm:$0xff] }
 0x1ea   : > { %v1626_v35 = vpack.c.bf16 %v1616_v4, %v1614_v3 }
 0x1ec   : > { %1826 = vmatprep.mubr.bf16.mxu0 %v1626_v35 }
 0x1ed   : > { %1827 = vmatmul.mubr.bf16.gmra.mxu0 %v1625_v5 }
 0x28d   : > { %v2499_v38 = vpop.f32.mrf.mxu0 }
 0x28f   : > { %v2500_v6 = vpop.f32.mrf.mxu0 }
 0x290   : > { %v2501_v36 = vadd.f32 %v2500_v6, %v2499_v38 }
 0x291   : > { %v2502_v26 = vpop.f32.mrf.mxu0 }
 0x292   : > { %v1797_v21 = vadd.f32 %v2501_v36, %v2439_v23 }
 0x293   : > { %v2503_v7 = vpop.f32.mrf.mxu0 }
 0x294   : > { %v2504_v40 = vadd.f32 %v2503_v7, %v2502_v26  ;;  %v1835_v11 = vmax.f32 %v1797_v21, 0.0 }
 0x295   : > { %v2505_v8 = vpop.f32.mrf.mxu0 }
 0x296   : > { %v1800_v10 = vadd.f32 %v2504_v40, %v2439_v23 }
 0x297   : > { %v2506_v25 = vpop.f32.mrf.mxu0 }
 0x298   : > { %v1836_v12 = vmax.f32 %v1800_v10, 0.0  ;;  %v2507_v14 = vadd.f32 %v2506_v25, %v2505_v8 }
 0x299   : > { %v2508_v42 = vpop.f32.mrf.mxu0 }
 0x29a   : > { %v1845_v39 = vpack.c.bf16 %v1836_v12, %v1835_v11  ;;  %v1805_v16 = vadd.f32 %v2507_v14, %v2439_v23 }
 0x29b   : > { %v2509_v43 = vpop.f32.mrf.mxu0 }
 0x29c   : > { %v2510_v27 = vadd.f32 %v2509_v43, %v2508_v42  ;;  %2547 = vmatmul.mubr.msk.bf16.vlgmr.msra.gmra.mxu1 %vm1889_vm1, %v1845_v39  ;;  %v1837_v41 = vmax.f32 %v1805_v16, 0.0 }
 0x29d   : > { %v2511_v37 = vpop.f32.mrf.mxu0  ;;  %2550 = vmatprep.mubr.msk.bf16.mxu1 %vm3178_vm0, %v3177_v9 }
 0x29e   : > { %v1808_v45 = vadd.f32 %v2510_v27, %v2439_v23 }
 0x29f   : > { %v2512_v30 = vpop.f32.mrf.mxu0 }
 0x2a0   : > { %v1838_v15 = vmax.f32 %v1808_v45, 0.0  ;;  %v2513_v28 = vadd.f32 %v2512_v30, %v2511_v37 }
 0x2a1   : > { %v2514_v48 = vpop.f32.mrf.mxu0 }
 0x2a2   : > { %v1846_v18 = vpack.c.bf16 %v1838_v15, %v1837_v41  ;;  %v1813_v44 = vadd.f32 %v2513_v28, %v2439_v23 }
 0x2a3   : > { %v2515_v13 = vpop.f32.mrf.mxu0 }
 0x2a4   : > { %v2516_v49 = vadd.f32 %v2515_v13, %v2514_v48  ;;  %2551 = vmatmul.mubr.msk.bf16.gmra.mxu1 %vm1889_vm1, %v1846_v18  ;;  %v1839_v50 = vmax.f32 %v1813_v44, 0.0 }
 0x2a5   : > { %v2517_v51 = vpop.f32.mrf.mxu0  ;;  %2554 = vmatprep.mubr.msk.bf16.mxu1 %vm3178_vm0, %v3177_v9 }
 0x2a6   : > { %v1816_v32 = vadd.f32 %v2516_v49, %v2439_v23 }
 0x2a7   : > { %v2518_v46 = vpop.f32.mrf.mxu0 }
 0x2a8   : > { %v1840_v57 = vmax.f32 %v1816_v32, 0.0  ;;  %v2519_v58 = vadd.f32 %v2518_v46, %v2517_v51 }
 0x2a9   : > { %v2520_v17 = vpop.f32.mrf.mxu0 }
 0x2aa   : > { %v1847_v54 = vpack.c.bf16 %v1840_v57, %v1839_v50  ;;  %v1821_v19 = vadd.f32 %v2519_v58, %v2439_v23 }
 0x2ab   : > { %v2521_v55 = vpop.f32.mrf.mxu0 }
 0x2ac   : > { %v2522_v22 = vadd.f32 %v2521_v55, %v2520_v17  ;;  %2555 = vmatmul.mubr.msk.bf16.gmra.mxu1 %vm1889_vm1, %v1847_v54  ;;  %v1841_v62 = vmax.f32 %v1821_v19, 0.0 }
 0x2ad   : > { %v2523_v61 = vpop.f32.mrf.mxu0  ;;  %2558 = vmatprep.mubr.msk.bf16.mxu1 %vm3178_vm0, %v3177_v9 }
 0x2ae   : > { %v1824_v31 = vadd.f32 %v2522_v22, %v2439_v23 }
 0x2af   : > { %v2524_v34 = vpop.f32.mrf.mxu0 }
 0x2b0   : > { %v1842_v52 = vmax.f32 %v1824_v31, 0.0  ;;  %v2525_v20 = vadd.f32 %v2524_v34, %v2523_v61 }
 0x2b1   : > { %v2526_v29 = vpop.f32.mrf.mxu0 }
 0x2b2   : > { %v1848_v53 = vpack.c.bf16 %v1842_v52, %v1841_v62  ;;  %v1829_v0 = vadd.f32 %v2525_v20, %v2439_v23 }
 0x2b3   : > { %v2527_v59 = vpop.f32.mrf.mxu0 }
 0x2b4   : > { %v2528_v47 = vadd.f32 %v2527_v59, %v2526_v29  ;;  %2559 = vmatmul.mubr.msk.bf16.gmra.mxu1 %vm1889_vm1, %v1848_v53  ;;  %v1843_v33 = vmax.f32 %v1829_v0, 0.0 }
 0x2b5   : > { %2562 = vmatprep.mubr.msk.bf16.mxu1 %vm3178_vm0, %v3177_v9 }
 0x2b6   : > { %v1832_v1 = vadd.f32 %v2528_v47, %v2439_v23 }
 0x2b8   : > { %v1844_v24 = vmax.f32 %v1832_v1, 0.0 }
 0x2ba   : > { %v1849_v56 = vpack.c.bf16 %v1844_v24, %v1843_v33 }
 0x2bc   : > { %2563 = vmatmul.mubr.msk.bf16.gmra.mxu1 %vm1889_vm1, %v1849_v56 }
 0x35c   : > { %v1939_v3 = vpop.f32.mrf.mxu1 }
 0x35d   : > { %v1940_v4 = vadd.f32 %v2456_v2, %v1939_v3 }
 0x35e   : > { %v2548_v63 = vpop.f32.mrf.mxu1 }
 0x35f   : > { %1979 = vst.msk [vmem:[%s3650_s10] sm:$0xff] %vm1978_vm2, %v1940_v4 }
 0x360   : > { %v1942_v9 = vpop.f32.mrf.mxu1 }
 0x361   : > { %v1943_v35 = vadd.f32 %v2456_v2, %v1942_v9 }
 0x362   : > { %v2549_v5 = vpop.f32.mrf.mxu1 }
 0x363   : > { %1980 = vst.msk [vmem:[%s3650_s10 + $0x8] sm:$0xff] %vm1978_vm2, %v1943_v35 }
 0x364   : > { %v1947_v60 = vpop.f32.mrf.mxu1 }
 0x365   : > { %v1948_v38 = vadd.f32 %v2456_v2, %v1947_v60 }
 0x366   : > { %v2552_v6 = vpop.f32.mrf.mxu1 }
 0x367   : > { %1981 = vst.msk [vmem:[%s3650_s10 + $0x10] sm:$0xff] %vm1978_vm2, %v1948_v38 }
 0x368   : > { %v1950_v36 = vpop.f32.mrf.mxu1 }
 0x369   : > { %v1951_v23 = vadd.f32 %v2456_v2, %v1950_v36 }
 0x36a   : > { %v2553_v26 = vpop.f32.mrf.mxu1 }
 0x36b   : > { %1982 = vst.msk [vmem:[%s3650_s10 + $0x18] sm:$0xff] %vm1978_vm2, %v1951_v23 }
 0x36c   : > { %v1955_v7 = vpop.f32.mrf.mxu1 }
 0x36d   : > { %v1956_v21 = vadd.f32 %v2456_v2, %v1955_v7 }
 0x36e   : > { %v2556_v40 = vpop.f32.mrf.mxu1 }
 0x36f   : > { %1983 = vst.msk [vmem:[%s3650_s10 + $0x20] sm:$0xff] %vm1978_vm2, %v1956_v21 }
 0x370   : > { %v1958_v8 = vpop.f32.mrf.mxu1 }
 0x371   : > { %v1959_v10 = vadd.f32 %v2456_v2, %v1958_v8 }
 0x372   : > { %v2557_v25 = vpop.f32.mrf.mxu1 }
 0x373   : > { %1984 = vst.msk [vmem:[%s3650_s10 + $0x28] sm:$0xff] %vm1978_vm2, %v1959_v10 }
 0x374   : > { %v1963_v11 = vpop.f32.mrf.mxu1 }
 0x375   : > { %v1964_v12 = vadd.f32 %v2456_v2, %v1963_v11 }
 0x376   : > { %v2560_v14 = vpop.f32.mrf.mxu1 }
 0x377   : > { %1985 = vst.msk [vmem:[%s3650_s10 + $0x30] sm:$0xff] %vm1978_vm2, %v1964_v12 }
 0x378   : > { %v1966_v42 = vpop.f32.mrf.mxu1 }
 0x379   : > { %v1967_v39 = vadd.f32 %v2456_v2, %v1966_v42 }
 0x37a   : > { %v2561_v43 = vpop.f32.mrf.mxu1 }
 0x37b   : > { %1986 = vst.msk [vmem:[%s3650_s10 + $0x38] sm:$0xff] %vm1978_vm2, %v1967_v39 }
 0x37c   : > { %v1971_v16 = vpop.f32.mrf.mxu1 }
 0x37d   : > { %v1972_v27 = vadd.f32 %v2456_v2, %v1971_v16 }
 0x37e   : > { %v2564_v37 = vpop.f32.mrf.mxu1 }
 0x37f   : > { %1987 = vst.msk [vmem:[%s3650_s10 + $0x40] sm:$0xff] %vm1978_vm2, %v1972_v27  ;;  %1995 = sbr.rel (!%p3756_p3) target bundleno = 953 (0x3b9), region = 72 }
 0x380   : > { %v1974_v45 = vpop.f32.mrf.mxu1 }
 0x381   : > { %v1975_v30 = vadd.f32 %v2456_v2, %v1974_v45 }
 0x382   : > { %v2565_v41 = vpop.f32.mrf.mxu1 }
 0x383   : > { %1988 = vst.msk [vmem:[%s3650_s10 + $0x48] sm:$0xff] %vm1978_vm2, %v1975_v30 }
 0x384   : > { %s3767_s30 = smov (!%p1998_p8, %s1997_s30), 10 }
 0x385   : > { %s2466_s19 = sshll.u32 %s3767_s30, 7 }
 0x386   : > { %p2469_p11 = scmp.eq.s32.totalorder %s2466_s19, 0 }
 0x387   : > { %2926 = sdivrem.u32 (!%p2469_p11), %s3767_s30, 10 }
 0x388   : > { %2006 = sbr.rel (%p2469_p11) target bundleno = 953 (0x3b9), region = 76 }
 0x390   : > { %s3685_s12 = spop.drf %2926 }
 0x391   : > { %p2470_p7 = scmp.le.s32.totalorder %s3685_s12, 0 }
 0x392   : > { %s3757_s28 = smov (!%p2470_p7), %s3679_s27  ;;  %s3758_s11 = smov (!%p2470_p7), %s3650_s10 }
 0x393   : > { %2209 = sbr.rel (%p2470_p7) target bundleno = 928 (0x3a0), region = 158  ;;  %s3694_s13 = smov (!%p2470_p7), 0  }
 0x394   : > { %s3696_s21 = smov (!%p2470_p7), 0  }
 0x398 LB: >> { %v2089_v15 = vld [vmem:[%s3142_s11] sm:$0xff]  ;;  %v2091_v28 = vld [vmem:[%s3142_s11 + $0x8] sm:$0xff]  ;;  %v2093_v48 = vld [vmem:[%s3142_s11 + $0x10] sm:$0xff]  ;;  %s2109_s22 = sadd.s32 1, %s3146_s13  ;;  %s2083_s21 = sadd.s32 1, %s3150_s21   ;;  %s3150_s21 = sphi %s3696_s21, %s2083_s21   ;;  %s3146_s13 = sphi %s3694_s13, %s3759_s13   ;;  %s3142_s11 = sphi %s3758_s11, %s2114_s11   ;;  %s3138_s28 = sphi %s3757_s28, %s2115_s28  }
 0x399   : >> { %2090 = vst [vmem:[%s3138_s28] sm:$0xff] %v2089_v15  ;;  %2092 = vst [vmem:[%s3138_s28 + $0x8] sm:$0xff] %v2091_v28  ;;  %v2095_v18 = vld [vmem:[%s3142_s11 + $0x18] sm:$0xff]  ;;  %v2097_v13 = vld [vmem:[%s3142_s11 + $0x20] sm:$0xff]  ;;  %p2110_p9 = scmp.ge.s32.totalorder %s2109_s22, %s3685_s12  ;;  %p2082_p5 = scmp.ge.s32.totalorder %s2083_s21, %s3685_s12 }
 0x39a   : >> { %2094 = vst [vmem:[%s3138_s28 + $0x10] sm:$0xff] %v2093_v48  ;;  %v2099_v44 = vld [vmem:[%s3142_s11 + $0x28] sm:$0xff]  ;;  %2096 = vst [vmem:[%s3138_s28 + $0x18] sm:$0xff] %v2095_v18  ;;  %v2101_v49 = vld [vmem:[%s3142_s11 + $0x30] sm:$0xff] }
 0x39b   : >> { %2098 = vst [vmem:[%s3138_s28 + $0x20] sm:$0xff] %v2097_v13  ;;  %2100 = vst [vmem:[%s3138_s28 + $0x28] sm:$0xff] %v2099_v44  ;;  %v2103_v51 = vld [vmem:[%s3142_s11 + $0x38] sm:$0xff]  ;;  %v2105_v32 = vld [vmem:[%s3142_s11 + $0x40] sm:$0xff]  ;;  %s3769_s22 = smov (%p2110_p9, %s2109_s22), 0  ;;  %2085 = sbr.rel (!%p2082_p5) target bundleno = 920 (0x398), region = 164 }
 0x39c   : >> { %2102 = vst [vmem:[%s3138_s28 + $0x30] sm:$0xff] %v2101_v49  ;;  %2104 = vst [vmem:[%s3138_s28 + $0x38] sm:$0xff] %v2103_v51  ;;  %v2107_v46 = vld [vmem:[%s3142_s11 + $0x48] sm:$0xff]  ;;  %s2112_s23 = smul.u32 80, %s3769_s22  ;;  %s3759_s13 = smov %s3769_s22 }
 0x39d   : >> { %2106 = vst [vmem:[%s3138_s28 + $0x40] sm:$0xff] %v2105_v32  ;;  %2108 = vst [vmem:[%s3138_s28 + $0x48] sm:$0xff] %v2107_v46 }
 0x39e   : >> { %s2114_s11 = scalar_lea.vmem %s3650_s10, %s2112_s23 [#allocation10]   ;;  %s2115_s28 = scalar_lea.vmem %s3679_s27, %s2112_s23  }
 0x3a0 PF: > { %2928 = sdivrem.u32 %s3767_s30, 10 }
 0x3a1   : > { %s2471_s8 = smul.u32 80, %s3685_s12 }
 0x3a3   : > { %s2120_s15 = scalar_lea.vmem %s3650_s10, %s2471_s8 [#allocation10]   ;;  %s2122_s16 = scalar_lea.vmem %s3679_s27, %s2471_s8  }
 0x3a9   : > { %s2929_s18 = spop.drf %2928 }
 0x3aa   : > { %p2473_p0 = scmp.le.s32.totalorder %s2929_s18, 0 }
 0x3ab   : > { %s3152_s20 = smov (!%p2473_p0), %s2122_s16   ;;  %s3156_s24 = smov (!%p2473_p0), %s2120_s15  }
 0x3ac   : > { %2223 = sbr.rel (%p2473_p0) target bundleno = 953 (0x3b9), region = 169  ;;  %s3160_s14 = smov (!%p2473_p0), 0  }
 0x3ad   : > { %s3164_s17 = smov (!%p2473_p0), 0  }
 0x3b1 LB: >> { %v2132_v50 = vld [vmem:[%s3158_s24] sm:$0xff]  ;;  %s2134_s19 = sadd.s32 1, %s3162_s14  ;;  %s2126_s17 = sadd.s32 1, %s3166_s17   ;;  %s3166_s17 = sphi %s3164_s17, %s2126_s17   ;;  %s3162_s14 = sphi %s3160_s14, %s3161_s14   ;;  %s3158_s24 = sphi %s3156_s24, %s2139_s24   ;;  %s3154_s20 = sphi %s3152_s20, %s2140_s20  }
 0x3b2   : >> { %2133 = vst [vmem:[%s3154_s20] sm:$0xff] %v2132_v50  ;;  %p2135_p13 = scmp.ge.s32.totalorder %s2134_s19, %s2929_s18  ;;  %p2125_p12 = scmp.ge.s32.totalorder %s2126_s17, %s2929_s18 }
 0x3b4   : >> { %s3771_s19 = smov (%p2135_p13, %s2134_s19), 0  ;;  %2128 = sbr.rel (!%p2125_p12) target bundleno = 945 (0x3b1), region = 175 }
 0x3b5   : >> { %s2474_s10 = sshll.u32 %s3771_s19, 3  ;;  %s3161_s14 = smov %s3771_s19  }
 0x3b6   : >> { %s2139_s24 = scalar_lea.vmem %s2120_s15, %s2474_s10 [#allocation10]   ;;  %s2140_s20 = scalar_lea.vmem %s2122_s16, %s2474_s10  }
 0x3b9 PF: > { %p19_p1 = scmp.ge.s32.totalorder %s3241_s29, 6   ;;  %s3760_s24 = smov %s3126_s25 }
 0x3ba   : > { %s3761_s25 = smov %s3130_s26  ;;  %s3762_s26 = smov %s3251_s9 }
 0x3bb   : > { %s3763_s27 = smov %s3241_s29  ;;  %21 = sbr.rel (!%p19_p1) target bundleno = 5 (0x5), region = 186 }
 0x3c0   :  { %2156 = vsyncpa [#allocation3], 1 }
 0x3c1   :  { %2158 = vsyncpa [#allocation3 + $0x1], 1 }
 0x3c2   :  { %2159 = vsyncpa [#allocation5], 1 }
 0x3c3   :  { %2160 = vsyncpa [#allocation8], 1 }

</bundles_post_ra>
